<compile_context>
chip_gen: v5e
topology: v5e:2x2
jax: 0.10.0
libtpu: 0.0.40
codegen_flags: <defaults>
</compile_context>

<pallas_src>
import numpy as np
import jax
import jax.numpy as jnp
from jax import lax
from jax.experimental import pallas as pl
from jax.experimental.pallas import tpu as pltpu

# ---- static problem geometry (from the PyTorch module) ----------------------
C_IN, C_OUT = 3, 112
C_IN_PAD = 8                      # pad contraction dim 3 -> 8 (one sublane group)
C_PAD = 128                       # pad output channels 112 -> 128 (dense rows)
KH, KW = 1, 4
PAD_H, PAD_W = 1, 1
H_IN, W_IN = 11, 13
H_OUT = (H_IN - 1) - 2 * PAD_H + KH           # 9
W_OUT = (W_IN - 1) - 2 * PAD_W + KW           # 14
W_STRIDE = W_IN + 2 * (KW - 1 - PAD_W)        # 17: padded row width
S_K = H_OUT * W_STRIDE                        # 153: kernel's strided spatial axis
ROWS_KEPT = H_IN - PAD_H                      # 10: crop only the top row
FLAT_LEN = ROWS_KEPT * W_STRIDE               # 170 >= S_K + (KW - 1)
N_VALID = H_OUT * W_OUT                       # 126 real spatial positions
EPS = 1e-5
NEG_SCALE = 2.498


def fused_kernel(x_ref, w_ref, gamma_ref, beta_ref, mask_ref, out_ref):
    # x_ref:     (8, 170)   flattened padded input, row stride 17
    # w_ref:     (4, 128, 8) per-tap weight (kw flip + channel padding folded in)
    # gamma/beta:(128, 1)   per-output-channel affine (zero in padded rows)
    # mask_ref:  (1, 153)   1/126 on the 126 valid columns, 0 elsewhere
    # out_ref:   (128, 153) channel-major output (valid cols: c % 17 < 14)
    y = jnp.dot(w_ref[0], x_ref[:, 0:S_K], preferred_element_type=jnp.float32)
    for kw in range(1, KW):
        y = y + jnp.dot(w_ref[kw], x_ref[:, kw:kw + S_K],
                        preferred_element_type=jnp.float32)

    # where(y > 0, y, y * 2.498)
    y3 = jnp.where(y > 0, y, y * NEG_SCALE)

    # single-pass batch statistics over the 126 valid spatial positions
    wm = mask_ref[...]                                  # (1, 153), value 1/126
    y3w = y3 * wm
    mean = jnp.sum(y3w, axis=-1, keepdims=True)         # (128, 1)
    ex2 = jnp.sum(y3w * y3, axis=-1, keepdims=True)     # E[y3^2]
    var = jnp.maximum(ex2 - mean * mean, 0.0)

    # fold BN into a per-channel scale/shift column, one slab multiply-add
    scale = lax.rsqrt(var + EPS) * gamma_ref[...]       # (128, 1)
    shift = beta_ref[...] - mean * scale                # (128, 1)
    out_ref[...] = y3 * scale + shift


def prepare_params(weight, gamma, beta):
    """One-time preparation (hoisted out of the per-call path).

    weight: (C_IN, C_OUT, KH, KW) PyTorch ConvTranspose2d layout.
    Returns (w_prep, gamma_col, beta_col, mask) device arrays.
    """
    # fold the kw flip: w_prep[kw, o, c] = weight[c, o, 0, KW-1-kw]
    wflip = weight[:, :, 0, ::-1]                                   # (3, 112, 4)
    w_prep = jnp.transpose(wflip, (2, 1, 0))                        # (4, 112, 3)
    w_prep = jnp.pad(w_prep, ((0, 0),
                              (0, C_PAD - C_OUT),
                              (0, C_IN_PAD - C_IN)))                # (4, 128, 8)
    gamma_col = jnp.pad(gamma, (0, C_PAD - C_OUT)).reshape(C_PAD, 1)
    beta_col = jnp.pad(beta, (0, C_PAD - C_OUT)).reshape(C_PAD, 1)
    # valid-column mask on the strided spatial axis, with 1/126 folded in
    cols = np.arange(S_K)
    valid = (cols % W_STRIDE) < W_OUT
    mask = jnp.asarray((valid.astype(np.float32) / float(N_VALID)).reshape(1, S_K))
    return w_prep, gamma_col, beta_col, mask


@jax.jit
def model_forward(x, w_prep, gamma_col, beta_col, mask):
    """x: (1, C_IN, H_IN, W_IN) NCHW float32."""
    # conv-transpose padding: crop the top row (keep the bottom row so the
    # shifted windows of the strided layout never read out of bounds), pad W
    # by (KW-1-PAD_W) on both sides, and pad channels 3 -> 8.  One lax.pad.
    xp = lax.pad(
        x, jnp.zeros((), x.dtype),
        ((0, 0, 0),
         (0, C_IN_PAD - C_IN, 0),
         (-PAD_H, 0, 0),
         (KW - 1 - PAD_W, KW - 1 - PAD_W, 0)))            # (1, 8, 10, 17)
    xpf = xp.reshape(C_IN_PAD, FLAT_LEN)                  # (8, 170), no data movement

    vmem = pl.BlockSpec(memory_space=pltpu.MemorySpace.VMEM)
    out_pad = pl.pallas_call(
        fused_kernel,
        out_shape=jax.ShapeDtypeStruct((C_PAD, S_K), jnp.float32),
        in_specs=[vmem, vmem, vmem, vmem, vmem],
        out_specs=vmem,
    )(xpf, w_prep, gamma_col, beta_col, mask)             # (128, 153) channel-major

    # drop padded channels and the 3 garbage columns per strided row -> NCHW
    out = out_pad[:C_OUT].reshape(C_OUT, H_OUT, W_STRIDE)[:, :, :W_OUT]
    return out[None]                                      # (1, 112, 9, 14)


def reference_forward(x, weight, gamma, beta):
    """Independent pure-JAX reference (scatter formulation of conv-transpose)."""
    t = jnp.einsum('chw,cok->ohwk', x[0], weight[:, :, 0, :])  # (112, 11, 13, 4)
    y_full = jnp.zeros((C_OUT, H_IN, W_IN + KW - 1), jnp.float32)
    for kw in range(KW):
        y_full = y_full.at[:, :, kw:kw + W_IN].add(t[..., kw])
    y = y_full[:, PAD_H:H_IN - PAD_H, PAD_W:W_IN + KW - 1 - PAD_W]  # (112, 9, 14)
    y3 = jnp.where(y > 0, y, y * NEG_SCALE)
    mean = jnp.mean(y3, axis=(1, 2), keepdims=True)
    var = jnp.mean((y3 - mean) ** 2, axis=(1, 2), keepdims=True)
    out = (y3 - mean) * lax.rsqrt(var + EPS)
    out = out * gamma[:, None, None] + beta[:, None, None]
    return out[None]


if __name__ == "__main__":
    key = jax.random.PRNGKey(0)
    kx, kw_key = jax.random.split(key)
    x = jax.random.normal(kx, (1, C_IN, H_IN, W_IN), jnp.float32)
    # deterministic ConvTranspose2d weight (PyTorch shape: (C_in, C_out, kH, kW))
    fan = C_OUT * KH * KW
    bound = 1.0 / (fan ** 0.5)
    weight = jax.random.uniform(kw_key, (C_IN, C_OUT, KH, KW), jnp.float32, -bound, bound)
    gamma = jnp.ones((C_OUT,), jnp.float32)
    beta = jnp.zeros((C_OUT,), jnp.float32)

    # one-time prep (hoisted out of the forward per perf review)
    params = prepare_params(weight, gamma, beta)
    params = jax.tree_util.tree_map(jax.block_until_ready, params)

    out = model_forward(x, *params)
    jax.block_until_ready(out)

    ref = reference_forward(x, weight, gamma, beta)
    assert out.shape == (1, C_OUT, H_OUT, W_OUT), out.shape
    if not jnp.allclose(out, ref, atol=1e-4, rtol=1e-4):
        raise AssertionError("Pallas kernel output mismatch vs reference")

    print("KERNEL_OK")
</pallas_src>

<mosaic_0001>
module attributes {stable_mosaic.version = 11 : i64} {
  func.func @fused_kernel(%arg0: memref<8x170xf32, #tpu.memory_space<vmem>>, %arg1: memref<4x128x8xf32, #tpu.memory_space<vmem>>, %arg2: memref<128x1xf32, #tpu.memory_space<vmem>>, %arg3: memref<128x1xf32, #tpu.memory_space<vmem>>, %arg4: memref<1x153xf32, #tpu.memory_space<vmem>>, %arg5: memref<128x153xf32, #tpu.memory_space<vmem>>) attributes {dimension_semantics = [], scalar_prefetch = 0 : i64, scratch_operands = 0 : i64, tpu.core_type = #tpu.core_type<tc>} {
    %c0 = arith.constant 0 : index
    %c0_0 = arith.constant 0 : index
    %c0_1 = arith.constant 0 : index
    %0 = vector.load %arg1[%c0, %c0_0, %c0_1] : memref<4x128x8xf32, #tpu.memory_space<vmem>>, vector<1x128x8xf32>
    %1 = vector.shape_cast %0 : vector<1x128x8xf32> to vector<128x8xf32>
    %c0_2 = arith.constant 0 : index
    %c0_3 = arith.constant 0 : index
    %2 = vector.load %arg0[%c0_2, %c0_3] : memref<8x170xf32, #tpu.memory_space<vmem>>, vector<8x153xf32>
    %cst = arith.constant dense<0.000000e+00> : vector<128x153xf32>
    %3 = tpu.matmul %1, %2, %cst {dimension_numbers = #tpu.dot_dimension_numbers<[1], [0], [0], [1], [0, 0, 1, 1], [], []>} : vector<128x8xf32>, vector<8x153xf32>, vector<128x153xf32> -> vector<128x153xf32>
    %c1 = arith.constant 1 : index
    %c0_4 = arith.constant 0 : index
    %c0_5 = arith.constant 0 : index
    %4 = vector.load %arg1[%c1, %c0_4, %c0_5] : memref<4x128x8xf32, #tpu.memory_space<vmem>>, vector<1x128x8xf32>
    %5 = vector.shape_cast %4 : vector<1x128x8xf32> to vector<128x8xf32>
    %c0_6 = arith.constant 0 : index
    %c1_7 = arith.constant 1 : index
    %6 = vector.load %arg0[%c0_6, %c1_7] : memref<8x170xf32, #tpu.memory_space<vmem>>, vector<8x153xf32>
    %cst_8 = arith.constant dense<0.000000e+00> : vector<128x153xf32>
    %7 = tpu.matmul %5, %6, %cst_8 {dimension_numbers = #tpu.dot_dimension_numbers<[1], [0], [0], [1], [0, 0, 1, 1], [], []>} : vector<128x8xf32>, vector<8x153xf32>, vector<128x153xf32> -> vector<128x153xf32>
    %8 = arith.addf %3, %7 : vector<128x153xf32>
    %c2 = arith.constant 2 : index
    %c0_9 = arith.constant 0 : index
    %c0_10 = arith.constant 0 : index
    %9 = vector.load %arg1[%c2, %c0_9, %c0_10] : memref<4x128x8xf32, #tpu.memory_space<vmem>>, vector<1x128x8xf32>
    %10 = vector.shape_cast %9 : vector<1x128x8xf32> to vector<128x8xf32>
    %c0_11 = arith.constant 0 : index
    %c2_12 = arith.constant 2 : index
    %11 = vector.load %arg0[%c0_11, %c2_12] : memref<8x170xf32, #tpu.memory_space<vmem>>, vector<8x153xf32>
    %cst_13 = arith.constant dense<0.000000e+00> : vector<128x153xf32>
    %12 = tpu.matmul %10, %11, %cst_13 {dimension_numbers = #tpu.dot_dimension_numbers<[1], [0], [0], [1], [0, 0, 1, 1], [], []>} : vector<128x8xf32>, vector<8x153xf32>, vector<128x153xf32> -> vector<128x153xf32>
    %13 = arith.addf %8, %12 : vector<128x153xf32>
    %c3 = arith.constant 3 : index
    %c0_14 = arith.constant 0 : index
    %c0_15 = arith.constant 0 : index
    %14 = vector.load %arg1[%c3, %c0_14, %c0_15] : memref<4x128x8xf32, #tpu.memory_space<vmem>>, vector<1x128x8xf32>
    %15 = vector.shape_cast %14 : vector<1x128x8xf32> to vector<128x8xf32>
    %c0_16 = arith.constant 0 : index
    %c3_17 = arith.constant 3 : index
    %16 = vector.load %arg0[%c0_16, %c3_17] : memref<8x170xf32, #tpu.memory_space<vmem>>, vector<8x153xf32>
    %cst_18 = arith.constant dense<0.000000e+00> : vector<128x153xf32>
    %17 = tpu.matmul %15, %16, %cst_18 {dimension_numbers = #tpu.dot_dimension_numbers<[1], [0], [0], [1], [0, 0, 1, 1], [], []>} : vector<128x8xf32>, vector<8x153xf32>, vector<128x153xf32> -> vector<128x153xf32>
    %18 = arith.addf %13, %17 : vector<128x153xf32>
    %cst_19 = arith.constant 0.000000e+00 : f32
    %19 = vector.broadcast %cst_19 : f32 to vector<128x153xf32>
    %20 = arith.cmpf ogt, %18, %19 : vector<128x153xf32>
    %cst_20 = arith.constant 2.498000e+00 : f32
    %21 = vector.broadcast %cst_20 : f32 to vector<128x153xf32>
    %22 = arith.mulf %18, %21 : vector<128x153xf32>
    %23 = arith.select %20, %18, %22 : vector<128x153xi1>, vector<128x153xf32>
    %c0_21 = arith.constant 0 : index
    %c0_22 = arith.constant 0 : index
    %24 = vector.load %arg4[%c0_21, %c0_22] : memref<1x153xf32, #tpu.memory_space<vmem>>, vector<1x153xf32>
    %25 = vector.broadcast %24 : vector<1x153xf32> to vector<128x153xf32>
    %26 = arith.mulf %23, %25 : vector<128x153xf32>
    %cst_23 = arith.constant dense<0.000000e+00> : vector<128xf32>
    %27 = vector.multi_reduction <add>, %26, %cst_23 [1] : vector<128x153xf32> to vector<128xf32>
    %28 = vector.shape_cast %27 : vector<128xf32> to vector<128x1xf32>
    %29 = arith.mulf %26, %23 : vector<128x153xf32>
    %cst_24 = arith.constant dense<0.000000e+00> : vector<128xf32>
    %30 = vector.multi_reduction <add>, %29, %cst_24 [1] : vector<128x153xf32> to vector<128xf32>
    %31 = vector.shape_cast %30 : vector<128xf32> to vector<128x1xf32>
    %32 = arith.mulf %28, %28 : vector<128x1xf32>
    %33 = arith.subf %31, %32 : vector<128x1xf32>
    %cst_25 = arith.constant 0.000000e+00 : f32
    %34 = vector.broadcast %cst_25 : f32 to vector<128x1xf32>
    %35 = arith.maximumf %33, %34 : vector<128x1xf32>
    %cst_26 = arith.constant 9.99999974E-6 : f32
    %36 = vector.broadcast %cst_26 : f32 to vector<128x1xf32>
    %37 = arith.addf %35, %36 : vector<128x1xf32>
    %38 = math.rsqrt %37 : vector<128x1xf32>
    %c0_27 = arith.constant 0 : index
    %c0_28 = arith.constant 0 : index
    %39 = vector.load %arg2[%c0_27, %c0_28] : memref<128x1xf32, #tpu.memory_space<vmem>>, vector<128x1xf32>
    %40 = arith.mulf %38, %39 : vector<128x1xf32>
    %c0_29 = arith.constant 0 : index
    %c0_30 = arith.constant 0 : index
    %41 = vector.load %arg3[%c0_29, %c0_30] : memref<128x1xf32, #tpu.memory_space<vmem>>, vector<128x1xf32>
    %42 = arith.mulf %28, %40 : vector<128x1xf32>
    %43 = arith.subf %41, %42 : vector<128x1xf32>
    %44 = vector.broadcast %40 : vector<128x1xf32> to vector<128x153xf32>
    %45 = arith.mulf %23, %44 : vector<128x153xf32>
    %46 = vector.broadcast %43 : vector<128x1xf32> to vector<128x153xf32>
    %47 = arith.addf %45, %46 : vector<128x153xf32>
    %c0_31 = arith.constant 0 : index
    %c0_32 = arith.constant 0 : index
    %48 = vector.load %arg5[%c0_31, %c0_32] : memref<128x153xf32, #tpu.memory_space<vmem>>, vector<128x153xf32>
    tpu.vector_store %arg5[%c0_31, %c0_32], %47 {strides = array<i32>} : memref<128x153xf32, #tpu.memory_space<vmem>>, vector<128x153xf32>,
    return
  }
}

</mosaic_0001>

<bundles_post_ra>
// kernel: model_forward.1
= control target key start
LH: loop header
LB: loop body
LE: loop exit
PB: predicated region body
PF: predicated region fallthrough
CT: control target
= control target key end

     0   :  { %vm65_vm0 = vcmask 64512   ;;  %s1981_s24 = smov 127   ;;  %s1982_s25 = smov 126   ;;  %vm61_vm1 = vcmask 1039360   ;;  %vm443_vm2 = vcmask 1031168   ;;  %vm678_vm3 = vcmask 1022976   ;;  %s3045_s0 = inlined_call_operand.vmem [shape: f32[8,170], index: 0, kind: input, shape index: {}]   ;;  %s3046_s1 = inlined_call_operand.vmem [shape: f32[4,128,8], index: 1, kind: input, shape index: {}]   ;;  %s3047_s4 = inlined_call_operand.vmem [shape: f32[1,153], index: 4, kind: input, shape index: {}]   ;;  %s3048_s2 = inlined_call_operand.vmem [shape: f32[128,1], index: 2, kind: input, shape index: {}]   ;;  %s3049_s3 = inlined_call_operand.vmem [shape: f32[128,1], index: 3, kind: input, shape index: {}]   ;;  %s3050_s5 = inlined_call_operand.vmem [shape: f32[128,153], index: 5, kind: output, shape index: {}]  }
   0x1   :  { %v36_v0 = vld [vmem:[%s3045_s0] sm:$0xff]  ;;  %v37_v1 = vld [vmem:[%s3045_s0 + $0x8] sm:$0xff]  ;;  %s1983_s26 = smov 125   ;;  %v22_v5 = vld [vmem:[%s3046_s1 + $0x10] sm:$0xff]  ;;  %vm1026_vm6 = vcmask 203776  }
   0x2   :  { %v20_v2 = vld [vmem:[%s3046_s1] sm:$0xff]  ;;  %v1931_v3 = vpack.i.bf16 %v37_v1, %v36_v0  ;;  %372 = vmatpush.msra.mxu3 %v37_v1  ;;  %307 = vmatpush.msra.mxu2 %v36_v0  ;;  %v21_v4 = vld [vmem:[%s3046_s1 + $0x8] sm:$0xff]  ;;  %v23_v6 = vld [vmem:[%s3046_s1 + $0x18] sm:$0xff] }
   0x3   :  { %1815 = vmatmul.msk.f32.vlgmr.msra.gmra.mxu3 %vm65_vm0, %v20_v2  ;;  %1799 = vmatmul.msk.f32.vlgmr.msra.gmra.mxu2 %vm65_vm0, %v20_v2  ;;  %v24_v7 = vld [vmem:[%s3046_s1 + $0x20] sm:$0xff]  ;;  %v25_v17 = vld [vmem:[%s3046_s1 + $0x28] sm:$0xff]  ;;  %v26_v23 = vld [vmem:[%s3046_s1 + $0x30] sm:$0xff] }
   0x4   :  { %1932 = vrot.lane.b32.xlu0 %v1931_v3, %s1981_s24  ;;  %1942 = vrot.lane.b32.xlu1 %v1931_v3, %s1982_s25  ;;  %v1751_v12 = vld [vmem:[%s3046_s1 + $0x80] sm:$0xff]  ;;  %v1752_v21 = vld [vmem:[%s3046_s1 + $0x88] sm:$0xff] }
   0x5   :  { %v1753_v24 = vld [vmem:[%s3046_s1 + $0x90] sm:$0xff]  ;;  %v27_v25 = vld [vmem:[%s3046_s1 + $0x38] sm:$0xff]  ;;  %v28_v27 = vld [vmem:[%s3046_s1 + $0x40] sm:$0xff] }
   0x6   :  { %v1754_v26 = vld [vmem:[%s3046_s1 + $0x98] sm:$0xff]  ;;  %v1755_v28 = vld [vmem:[%s3046_s1 + $0xa0] sm:$0xff]  ;;  %v29_v29 = vld [vmem:[%s3046_s1 + $0x48] sm:$0xff] }
   0x7   :  { %v1756_v30 = vld [vmem:[%s3046_s1 + $0xa8] sm:$0xff]  ;;  %v30_v31 = vld [vmem:[%s3046_s1 + $0x50] sm:$0xff]  ;;  %v31_v33 = vld [vmem:[%s3046_s1 + $0x58] sm:$0xff] }
   0x8   :  { %v1757_v32 = vld [vmem:[%s3046_s1 + $0xb0] sm:$0xff]  ;;  %v1758_v34 = vld [vmem:[%s3046_s1 + $0xb8] sm:$0xff]  ;;  %v32_v35 = vld [vmem:[%s3046_s1 + $0x60] sm:$0xff] }
   0x9   :  { %v1759_v36 = vld [vmem:[%s3046_s1 + $0xc0] sm:$0xff]  ;;  %v33_v37 = vld [vmem:[%s3046_s1 + $0x68] sm:$0xff]  ;;  %v34_v39 = vld [vmem:[%s3046_s1 + $0x70] sm:$0xff] }
   0xa   :  { %v1760_v38 = vld [vmem:[%s3046_s1 + $0xc8] sm:$0xff]  ;;  %v1761_v40 = vld [vmem:[%s3046_s1 + $0xd0] sm:$0xff]  ;;  %v35_v41 = vld [vmem:[%s3046_s1 + $0x78] sm:$0xff] }
   0xb   :  { %1816 = vmatmul.msk.f32.gmra.mxu3 %vm65_vm0, %v21_v4  ;;  %1800 = vmatmul.msk.f32.gmra.mxu2 %vm65_vm0, %v21_v4  ;;  %v1762_v42 = vld [vmem:[%s3046_s1 + $0xd8] sm:$0xff]  ;;  %v1879_v43 = vld [vmem:[%s3046_s1 + $0x180] sm:$0xff]  ;;  %v1880_v47 = vld [vmem:[%s3046_s1 + $0x188] sm:$0xff] }
   0xc   :  { %1937 = vrot.lane.b32.xlu0 %v1931_v3, %s1983_s26  ;;  %v1763_v44 = vld [vmem:[%s3046_s1 + $0xe0] sm:$0xff]  ;;  %v1764_v48 = vld [vmem:[%s3046_s1 + $0xe8] sm:$0xff]  ;;  %v1881_v51 = vld [vmem:[%s3046_s1 + $0x190] sm:$0xff] }
   0xd   :  { %v1765_v52 = vld [vmem:[%s3046_s1 + $0xf0] sm:$0xff]  ;;  %v1882_v55 = vld [vmem:[%s3046_s1 + $0x198] sm:$0xff]  ;;  %v1883_v59 = vld [vmem:[%s3046_s1 + $0x1a0] sm:$0xff] }
   0xe   :  { %v1766_v56 = vld [vmem:[%s3046_s1 + $0xf8] sm:$0xff]  ;;  %v1831_v61 = vld [vmem:[%s3046_s1 + $0x100] sm:$0xff]  ;;  %v1884_v1 = vld [vmem:[%s3046_s1 + $0x1a8] sm:$0xff] }
   0xf   :  { %v1832_v3 = vld [vmem:[%s3046_s1 + $0x108] sm:$0xff] }
  0x13   :  { %1817 = vmatmul.msk.f32.gmra.mxu3 %vm65_vm0, %v22_v5  ;;  %1801 = vmatmul.msk.f32.gmra.mxu2 %vm65_vm0, %v22_v5 }
  0x1b   :  { %1818 = vmatmul.msk.f32.gmra.mxu3 %vm65_vm0, %v23_v6  ;;  %1802 = vmatmul.msk.f32.gmra.mxu2 %vm65_vm0, %v23_v6 }
  0x23   :  { %1819 = vmatmul.msk.f32.gmra.mxu3 %vm65_vm0, %v24_v7  ;;  %1803 = vmatmul.msk.f32.gmra.mxu2 %vm65_vm0, %v24_v7  ;;  %v1885_v7 = vld [vmem:[%s3046_s1 + $0x1b0] sm:$0xff] }
  0x2b   :  { %1820 = vmatmul.msk.f32.gmra.mxu3 %vm65_vm0, %v25_v17  ;;  %1804 = vmatmul.msk.f32.gmra.mxu2 %vm65_vm0, %v25_v17 }
  0x33   :  { %1821 = vmatmul.msk.f32.gmra.mxu3 %vm65_vm0, %v26_v23  ;;  %1805 = vmatmul.msk.f32.gmra.mxu2 %vm65_vm0, %v26_v23 }
  0x3b   :  { %1822 = vmatmul.msk.f32.gmra.mxu3 %vm65_vm0, %v27_v25  ;;  %1806 = vmatmul.msk.f32.gmra.mxu2 %vm65_vm0, %v27_v25  ;;  %v1888_v25 = vld [vmem:[%s3046_s1 + $0x1c8] sm:$0xff] }
  0x43   :  { %1823 = vmatmul.msk.f32.gmra.mxu3 %vm65_vm0, %v28_v27  ;;  %1807 = vmatmul.msk.f32.gmra.mxu2 %vm65_vm0, %v28_v27  ;;  %v1836_v27 = vld [vmem:[%s3046_s1 + $0x128] sm:$0xff] }
  0x4b   :  { %1824 = vmatmul.msk.f32.gmra.mxu3 %vm65_vm0, %v29_v29  ;;  %1808 = vmatmul.msk.f32.gmra.mxu2 %vm65_vm0, %v29_v29 }
  0x53   :  { %1825 = vmatmul.msk.f32.gmra.mxu3 %vm65_vm0, %v30_v31  ;;  %1809 = vmatmul.msk.f32.gmra.mxu2 %vm65_vm0, %v30_v31  ;;  %v1889_v31 = vld [vmem:[%s3046_s1 + $0x1d0] sm:$0xff] }
  0x5b   :  { %1826 = vmatmul.msk.f32.gmra.mxu3 %vm65_vm0, %v31_v33  ;;  %1810 = vmatmul.msk.f32.gmra.mxu2 %vm65_vm0, %v31_v33  ;;  %v1837_v33 = vld [vmem:[%s3046_s1 + $0x130] sm:$0xff] }
  0x63   :  { %1827 = vmatmul.msk.f32.gmra.mxu3 %vm65_vm0, %v32_v35  ;;  %1811 = vmatmul.msk.f32.gmra.mxu2 %vm65_vm0, %v32_v35 }
  0x6b   :  { %1828 = vmatmul.msk.f32.gmra.mxu3 %vm65_vm0, %v33_v37  ;;  %1812 = vmatmul.msk.f32.gmra.mxu2 %vm65_vm0, %v33_v37  ;;  %v1890_v37 = vld [vmem:[%s3046_s1 + $0x1d8] sm:$0xff] }
  0x73   :  { %1829 = vmatmul.msk.f32.gmra.mxu3 %vm65_vm0, %v34_v39  ;;  %1813 = vmatmul.msk.f32.gmra.mxu2 %vm65_vm0, %v34_v39  ;;  %v1838_v39 = vld [vmem:[%s3046_s1 + $0x138] sm:$0xff] }
  0x76   :  { %v1933_v8 = vpop.permute.xlu0 %1932  ;;  %v1943_v9 = vpop.permute.xlu1 %1942 }
  0x77   :  { %v1934_v10 = vunpack.i.l.bf16 %v1933_v8  ;;  %v1935_v11 = vunpack.i.h.bf16 %v1933_v8  ;;  %v1944_v13 = vunpack.i.l.bf16 %v1943_v9  ;;  %v1945_v14 = vunpack.i.h.bf16 %v1943_v9  ;;  %v1833_v9 = vld [vmem:[%s3046_s1 + $0x110] sm:$0xff] }
  0x79   :  { %194 = vmatpush.msra.mxu1 %v1935_v11  ;;  %v62_v15 = vsel %vm61_vm1, %v1934_v10, %v1935_v11  ;;  %v444_v16 = vsel %vm443_vm2, %v1944_v13, %v1945_v14  ;;  %v1886_v13 = vld [vmem:[%s3046_s1 + $0x1b8] sm:$0xff] }
  0x7a   :  { %129 = vmatpush.msra.mxu0 %v62_v15  ;;  %1783 = vmatmul.msk.f32.vlgmr.msra.gmra.mxu1 %vm65_vm0, %v1751_v12  ;;  %v1834_v15 = vld [vmem:[%s3046_s1 + $0x118] sm:$0xff] }
  0x7b   :  { %1767 = vmatmul.msk.f32.vlgmr.msra.gmra.mxu0 %vm65_vm0, %v1751_v12  ;;  %575 = vmatpush.msrb.mxu1 %v1945_v14 }
  0x7c   :  { %510 = vmatpush.msrb.mxu0 %v444_v16  ;;  %1830 = vmatmul.msk.f32.gmra.mxu3 %vm65_vm0, %v35_v41 }
  0x7d   :  { %1814 = vmatmul.msk.f32.gmra.mxu2 %vm65_vm0, %v35_v41 }
  0x7e   :  { %v1938_v18 = vpop.permute.xlu0 %1937 }
  0x7f   :  { %v1939_v19 = vunpack.i.l.bf16 %v1938_v18  ;;  %v1940_v20 = vunpack.i.h.bf16 %v1938_v18 }
  0x81   :  { %810 = vmatpush.msrb.mxu3 %v1940_v20  ;;  %v679_v22 = vsel %vm678_vm3, %v1939_v19, %v1940_v20  ;;  %v1887_v19 = vld [vmem:[%s3046_s1 + $0x1c0] sm:$0xff] }
  0x82   :  { %1784 = vmatmul.msk.f32.gmra.mxu1 %vm65_vm0, %v1752_v21  ;;  %745 = vmatpush.msrb.mxu2 %v679_v22 }
  0x83   :  { %1768 = vmatmul.msk.f32.gmra.mxu0 %vm65_vm0, %v1752_v21  ;;  %v1835_v21 = vld [vmem:[%s3046_s1 + $0x120] sm:$0xff] }
  0x84   :  { %1911 = vmatmul.msk.f32.vlgmr.msrb.gmra.mxu3 %vm65_vm0, %v1879_v43 }
  0x85   :  { %1895 = vmatmul.msk.f32.vlgmr.msrb.gmra.mxu2 %vm65_vm0, %v1879_v43  ;;  %v1891_v43 = vld [vmem:[%s3046_s1 + $0x1e0] sm:$0xff] }
  0x86   :  { %v2169_v45 = vpop.f32.mrf.mxu3  ;;  %v2171_v46 = vpop.f32.mrf.mxu2 }
  0x8a   :  { %1785 = vmatmul.msk.f32.gmra.mxu1 %vm65_vm0, %v1753_v24 }
  0x8b   :  { %1769 = vmatmul.msk.f32.gmra.mxu0 %vm65_vm0, %v1753_v24 }
  0x8c   :  { %1912 = vmatmul.msk.f32.gmra.mxu3 %vm65_vm0, %v1880_v47 }
  0x8d   :  { %1896 = vmatmul.msk.f32.gmra.mxu2 %vm65_vm0, %v1880_v47  ;;  %v1839_v47 = vld [vmem:[%s3046_s1 + $0x140] sm:$0xff] }
  0x8e   :  { %v2183_v49 = vpop.f32.mrf.mxu3  ;;  %v2185_v50 = vpop.f32.mrf.mxu2 }
  0x92   :  { %1786 = vmatmul.msk.f32.gmra.mxu1 %vm65_vm0, %v1754_v26 }
  0x93   :  { %1770 = vmatmul.msk.f32.gmra.mxu0 %vm65_vm0, %v1754_v26 }
  0x94   :  { %1913 = vmatmul.msk.f32.gmra.mxu3 %vm65_vm0, %v1881_v51 }
  0x95   :  { %1897 = vmatmul.msk.f32.gmra.mxu2 %vm65_vm0, %v1881_v51 }
  0x96   :  { %v2197_v53 = vpop.f32.mrf.mxu3  ;;  %v2199_v54 = vpop.f32.mrf.mxu2 }
  0x9a   :  { %1787 = vmatmul.msk.f32.gmra.mxu1 %vm65_vm0, %v1755_v28 }
  0x9b   :  { %1771 = vmatmul.msk.f32.gmra.mxu0 %vm65_vm0, %v1755_v28 }
  0x9c   :  { %1914 = vmatmul.msk.f32.gmra.mxu3 %vm65_vm0, %v1882_v55 }
  0x9d   :  { %1898 = vmatmul.msk.f32.gmra.mxu2 %vm65_vm0, %v1882_v55 }
  0x9e   :  { %v2211_v57 = vpop.f32.mrf.mxu3  ;;  %v2213_v58 = vpop.f32.mrf.mxu2 }
  0xa2   :  { %1788 = vmatmul.msk.f32.gmra.mxu1 %vm65_vm0, %v1756_v30 }
  0xa3   :  { %1772 = vmatmul.msk.f32.gmra.mxu0 %vm65_vm0, %v1756_v30 }
  0xa4   :  { %1915 = vmatmul.msk.f32.gmra.mxu3 %vm65_vm0, %v1883_v59 }
  0xa5   :  { %1899 = vmatmul.msk.f32.gmra.mxu2 %vm65_vm0, %v1883_v59  ;;  %v1892_v59 = vld [vmem:[%s3046_s1 + $0x1e8] sm:$0xff] }
  0xa6   :  { %v2227_v62 = vpop.f32.mrf.mxu3  ;;  %v2231_v0 = vpop.f32.mrf.mxu2 }
  0xaa   :  { %1789 = vmatmul.msk.f32.gmra.mxu1 %vm65_vm0, %v1757_v32 }
  0xab   :  { %1773 = vmatmul.msk.f32.gmra.mxu0 %vm65_vm0, %v1757_v32 }
  0xac   :  { %1916 = vmatmul.msk.f32.gmra.mxu3 %vm65_vm0, %v1884_v1 }
  0xad   :  { %1900 = vmatmul.msk.f32.gmra.mxu2 %vm65_vm0, %v1884_v1  ;;  %v1840_v1 = vld [vmem:[%s3046_s1 + $0x148] sm:$0xff] }
  0xae   :  { %v2245_v4 = vpop.f32.mrf.mxu3  ;;  %v2249_v6 = vpop.f32.mrf.mxu2 }
  0xb2   :  { %1790 = vmatmul.msk.f32.gmra.mxu1 %vm65_vm0, %v1758_v34 }
  0xb3   :  { %1774 = vmatmul.msk.f32.gmra.mxu0 %vm65_vm0, %v1758_v34 }
  0xb4   :  { %1917 = vmatmul.msk.f32.gmra.mxu3 %vm65_vm0, %v1885_v7 }
  0xb5   :  { %1901 = vmatmul.msk.f32.gmra.mxu2 %vm65_vm0, %v1885_v7 }
  0xb6   :  { %v2263_v10 = vpop.f32.mrf.mxu3  ;;  %v2267_v12 = vpop.f32.mrf.mxu2 }
  0xba   :  { %1791 = vmatmul.msk.f32.gmra.mxu1 %vm65_vm0, %v1759_v36 }
  0xbb   :  { %1775 = vmatmul.msk.f32.gmra.mxu0 %vm65_vm0, %v1759_v36 }
  0xbc   :  { %1918 = vmatmul.msk.f32.gmra.mxu3 %vm65_vm0, %v1886_v13 }
  0xbd   :  { %1902 = vmatmul.msk.f32.gmra.mxu2 %vm65_vm0, %v1886_v13 }
  0xbe   :  { %v2281_v16 = vpop.f32.mrf.mxu3  ;;  %v2285_v18 = vpop.f32.mrf.mxu2 }
  0xc2   :  { %1792 = vmatmul.msk.f32.gmra.mxu1 %vm65_vm0, %v1760_v38 }
  0xc3   :  { %1776 = vmatmul.msk.f32.gmra.mxu0 %vm65_vm0, %v1760_v38 }
  0xc4   :  { %1919 = vmatmul.msk.f32.gmra.mxu3 %vm65_vm0, %v1887_v19 }
  0xc5   :  { %1903 = vmatmul.msk.f32.gmra.mxu2 %vm65_vm0, %v1887_v19  ;;  %v1893_v19 = vld [vmem:[%s3046_s1 + $0x1f0] sm:$0xff] }
  0xc6   :  { %v398_v22 = vpop.f32.mrf.mxu3  ;;  %v333_v24 = vpop.f32.mrf.mxu2 }
  0xca   :  { %1793 = vmatmul.msk.f32.gmra.mxu1 %vm65_vm0, %v1761_v40 }
  0xcb   :  { %1777 = vmatmul.msk.f32.gmra.mxu0 %vm65_vm0, %v1761_v40 }
  0xcc   :  { %1920 = vmatmul.msk.f32.gmra.mxu3 %vm65_vm0, %v1888_v25 }
  0xcd   :  { %1904 = vmatmul.msk.f32.gmra.mxu2 %vm65_vm0, %v1888_v25 }
  0xce   :  { %v401_v28 = vpop.f32.mrf.mxu3  ;;  %v336_v30 = vpop.f32.mrf.mxu2 }
  0xd2   :  { %1794 = vmatmul.msk.f32.gmra.mxu1 %vm65_vm0, %v1762_v42 }
  0xd3   :  { %1778 = vmatmul.msk.f32.gmra.mxu0 %vm65_vm0, %v1762_v42 }
  0xd4   :  { %1921 = vmatmul.msk.f32.gmra.mxu3 %vm65_vm0, %v1889_v31 }
  0xd5   :  { %1905 = vmatmul.msk.f32.gmra.mxu2 %vm65_vm0, %v1889_v31  ;;  %v1894_v31 = vld [vmem:[%s3046_s1 + $0x1f8] sm:$0xff] }
  0xd6   :  { %v404_v34 = vpop.f32.mrf.mxu3  ;;  %v339_v36 = vpop.f32.mrf.mxu2 }
  0xda   :  { %1795 = vmatmul.msk.f32.gmra.mxu1 %vm65_vm0, %v1763_v44 }
  0xdb   :  { %1779 = vmatmul.msk.f32.gmra.mxu0 %vm65_vm0, %v1763_v44 }
  0xdc   :  { %1922 = vmatmul.msk.f32.gmra.mxu3 %vm65_vm0, %v1890_v37 }
  0xdd   :  { %1906 = vmatmul.msk.f32.gmra.mxu2 %vm65_vm0, %v1890_v37 }
  0xde   :  { %v407_v40 = vpop.f32.mrf.mxu3  ;;  %v342_v42 = vpop.f32.mrf.mxu2 }
  0xe2   :  { %1796 = vmatmul.msk.f32.gmra.mxu1 %vm65_vm0, %v1764_v48 }
  0xe3   :  { %1780 = vmatmul.msk.f32.gmra.mxu0 %vm65_vm0, %v1764_v48 }
  0xe4   :  { %1923 = vmatmul.msk.f32.gmra.mxu3 %vm65_vm0, %v1891_v43 }
  0xe5   :  { %1907 = vmatmul.msk.f32.gmra.mxu2 %vm65_vm0, %v1891_v43 }
  0xe6   :  { %v410_v48 = vpop.f32.mrf.mxu3  ;;  %v345_v55 = vpop.f32.mrf.mxu2 }
  0xea   :  { %1797 = vmatmul.msk.f32.gmra.mxu1 %vm65_vm0, %v1765_v52 }
  0xeb   :  { %1781 = vmatmul.msk.f32.gmra.mxu0 %vm65_vm0, %v1765_v52 }
  0xec   :  { %1924 = vmatmul.msk.f32.gmra.mxu3 %vm65_vm0, %v1892_v59 }
  0xed   :  { %1908 = vmatmul.msk.f32.gmra.mxu2 %vm65_vm0, %v1892_v59 }
  0xee   :  { %v348_v13 = vpop.f32.mrf.mxu2 }
  0xf2   :  { %1798 = vmatmul.msk.f32.gmra.mxu1 %vm65_vm0, %v1766_v56 }
  0xf3   :  { %1782 = vmatmul.msk.f32.gmra.mxu0 %vm65_vm0, %v1766_v56 }
  0xf4   :  { %1925 = vmatmul.msk.f32.gmra.mxu3 %vm65_vm0, %v1893_v19 }
  0xf5   :  { %1909 = vmatmul.msk.f32.gmra.mxu2 %vm65_vm0, %v1893_v19  ;;  %v1844_v19 = vld [vmem:[%s3046_s1 + $0x168] sm:$0xff] }
  0xf7   :  { %v2222_v60 = vpop.f32.mrf.mxu1 }
  0xf8   :  { %v2229_v63 = vpop.f32.mrf.mxu0 }
  0xfa   :  { %1863 = vmatmul.msk.f32.vlgmr.msrb.gmra.mxu1 %vm65_vm0, %v1831_v61 }
  0xfb   :  { %1847 = vmatmul.msk.f32.vlgmr.msrb.gmra.mxu0 %vm65_vm0, %v1831_v61 }
  0xfc   :  { %1926 = vmatmul.msk.f32.gmra.mxu3 %vm65_vm0, %v1894_v31 }
  0xfd   :  { %1910 = vmatmul.msk.f32.gmra.mxu2 %vm65_vm0, %v1894_v31 }
  0xff   :  { %v2240_v2 = vpop.f32.mrf.mxu1 }
 0x100   :  { %v2247_v5 = vpop.f32.mrf.mxu0 }
 0x102   :  { %1864 = vmatmul.msk.f32.gmra.mxu1 %vm65_vm0, %v1832_v3 }
 0x103   :  { %1848 = vmatmul.msk.f32.gmra.mxu0 %vm65_vm0, %v1832_v3  ;;  %v413_v3 = vpop.f32.mrf.mxu3 }
 0x107   :  { %v2258_v8 = vpop.f32.mrf.mxu1 }
 0x108   :  { %v2265_v11 = vpop.f32.mrf.mxu0 }
 0x10a   :  { %1865 = vmatmul.msk.f32.gmra.mxu1 %vm65_vm0, %v1833_v9 }
 0x10b   :  { %1849 = vmatmul.msk.f32.gmra.mxu0 %vm65_vm0, %v1833_v9 }
 0x10f   :  { %v2276_v14 = vpop.f32.mrf.mxu1 }
 0x110   :  { %v2283_v17 = vpop.f32.mrf.mxu0 }
 0x112   :  { %1866 = vmatmul.msk.f32.gmra.mxu1 %vm65_vm0, %v1834_v15 }
 0x113   :  { %1850 = vmatmul.msk.f32.gmra.mxu0 %vm65_vm0, %v1834_v15 }
 0x117   :  { %v2294_v20 = vpop.f32.mrf.mxu1 }
 0x118   :  { %v2299_v23 = vpop.f32.mrf.mxu0 }
 0x11a   :  { %1867 = vmatmul.msk.f32.gmra.mxu1 %vm65_vm0, %v1835_v21 }
 0x11b   :  { %1851 = vmatmul.msk.f32.gmra.mxu0 %vm65_vm0, %v1835_v21 }
 0x11f   :  { %v2308_v26 = vpop.f32.mrf.mxu1 }
 0x120   :  { %v2313_v29 = vpop.f32.mrf.mxu0 }
 0x122   :  { %1868 = vmatmul.msk.f32.gmra.mxu1 %vm65_vm0, %v1836_v27 }
 0x123   :  { %1852 = vmatmul.msk.f32.gmra.mxu0 %vm65_vm0, %v1836_v27 }
 0x127   :  { %v2322_v32 = vpop.f32.mrf.mxu1 }
 0x128   :  { %v2327_v35 = vpop.f32.mrf.mxu0 }
 0x12a   :  { %1869 = vmatmul.msk.f32.gmra.mxu1 %vm65_vm0, %v1837_v33 }
 0x12b   :  { %1853 = vmatmul.msk.f32.gmra.mxu0 %vm65_vm0, %v1837_v33 }
 0x12f   :  { %v2336_v38 = vpop.f32.mrf.mxu1 }
 0x130   :  { %v2341_v41 = vpop.f32.mrf.mxu0 }
 0x132   :  { %1870 = vmatmul.msk.f32.gmra.mxu1 %vm65_vm0, %v1838_v39 }
 0x133   :  { %1854 = vmatmul.msk.f32.gmra.mxu0 %vm65_vm0, %v1838_v39 }
 0x137   :  { %v220_v44 = vpop.f32.mrf.mxu1 }
 0x138   :  { %v155_v51 = vpop.f32.mrf.mxu0  ;;  %v2353_v52 = vadd.f32 %v398_v22, %v220_v44  ;;  %v1841_v22 = vld [vmem:[%s3046_s1 + $0x150] sm:$0xff] }
 0x139   :  { %v2355_v56 = vadd.f32 %v333_v24, %v155_v51  ;;  %v416_v24 = vpop.f32.mrf.mxu3  ;;  %v1843_v51 = vld [vmem:[%s3046_s1 + $0x160] sm:$0xff] }
 0x13a   :  { %1871 = vmatmul.msk.f32.gmra.mxu1 %vm65_vm0, %v1839_v47 }
 0x13b   :  { %1855 = vmatmul.msk.f32.gmra.mxu0 %vm65_vm0, %v1839_v47 }
 0x13f   :  { %v223_v61 = vpop.f32.mrf.mxu1 }
 0x140   :  { %v158_v7 = vpop.f32.mrf.mxu0  ;;  %v2367_v9 = vadd.f32 %v401_v28, %v223_v61  ;;  %v351_v28 = vpop.f32.mrf.mxu2 }
 0x141   :  { %v2369_v15 = vadd.f32 %v336_v30, %v158_v7  ;;  %v419_v43 = vpop.f32.mrf.mxu3 }
 0x142   :  { %1872 = vmatmul.msk.f32.gmra.mxu1 %vm65_vm0, %v1840_v1 }
 0x143   :  { %1856 = vmatmul.msk.f32.gmra.mxu0 %vm65_vm0, %v1840_v1 }
 0x147   :  { %v226_v21 = vpop.f32.mrf.mxu1 }
 0x148   :  { %v161_v25 = vpop.f32.mrf.mxu0  ;;  %v2381_v27 = vadd.f32 %v404_v34, %v226_v21  ;;  %v1842_v34 = vld [vmem:[%s3046_s1 + $0x158] sm:$0xff]  ;;  %v354_v44 = vpop.f32.mrf.mxu2 }
 0x149   :  { %v2383_v30 = vadd.f32 %v339_v36, %v161_v25 }
 0x14a   :  { %1873 = vmatmul.msk.f32.gmra.mxu1 %vm65_vm0, %v1841_v22 }
 0x14b   :  { %1857 = vmatmul.msk.f32.gmra.mxu0 %vm65_vm0, %v1841_v22 }
 0x14f   :  { %v229_v33 = vpop.f32.mrf.mxu1 }
 0x150   :  { %v164_v37 = vpop.f32.mrf.mxu0  ;;  %v2395_v36 = vadd.f32 %v407_v40, %v229_v33  ;;  %v812_v40 = vpop.f32.mrf.mxu3  ;;  %v1845_v33 = vld [vmem:[%s3046_s1 + $0x170] sm:$0xff] }
 0x151   :  { %v2397_v39 = vadd.f32 %v342_v42, %v164_v37  ;;  %v747_v42 = vpop.f32.mrf.mxu2 }
 0x152   :  { %1874 = vmatmul.msk.f32.gmra.mxu1 %vm65_vm0, %v1842_v34 }
 0x153   :  { %1858 = vmatmul.msk.f32.gmra.mxu0 %vm65_vm0, %v1842_v34 }
 0x157   :  { %v232_v47 = vpop.f32.mrf.mxu1 }
 0x158   :  { %v167_v59 = vpop.f32.mrf.mxu0  ;;  %v2404_v61 = vadd.f32 %v410_v48, %v232_v47  ;;  %v815_v48 = vpop.f32.mrf.mxu3 }
 0x159   :  { %v2406_v1 = vadd.f32 %v345_v55, %v167_v59  ;;  %v750_v55 = vpop.f32.mrf.mxu2  ;;  %v1846_v59 = vld [vmem:[%s3046_s1 + $0x178] sm:$0xff] }
 0x15a   :  { %1875 = vmatmul.msk.f32.gmra.mxu1 %vm65_vm0, %v1843_v51 }
 0x15b   :  { %1859 = vmatmul.msk.f32.gmra.mxu0 %vm65_vm0, %v1843_v51 }
 0x15f   :  { %v235_v7 = vpop.f32.mrf.mxu1 }
 0x160   :  { %v170_v21 = vpop.f32.mrf.mxu0  ;;  %v2413_v22 = vadd.f32 %v413_v3, %v235_v7  ;;  %v2428_v3 = vpop.f32.mrf.mxu3 }
 0x161   :  { %v2415_v25 = vadd.f32 %v348_v13, %v170_v21  ;;  %v2430_v13 = vpop.f32.mrf.mxu2  ;;  %v310_v21 = vadd.f32 %v2171_v46, %v2229_v63  ;;  %v378_v63 = vadd.f32 %v2183_v49, %v2240_v2 }
 0x162   :  { %1876 = vmatmul.msk.f32.gmra.mxu1 %vm65_vm0, %v1844_v19 }
 0x163   :  { %1860 = vmatmul.msk.f32.gmra.mxu0 %vm65_vm0, %v1844_v19 }
 0x167   :  { %v238_v31 = vpop.f32.mrf.mxu1 }
 0x168   :  { %v173_v34 = vpop.f32.mrf.mxu0  ;;  %v2422_v37 = vadd.f32 %v416_v24, %v238_v31 }
 0x169   :  { %v2424_v47 = vadd.f32 %v351_v28, %v173_v34  ;;  %v375_v28 = vadd.f32 %v2169_v45, %v2222_v60 }
 0x16a   :  { %1877 = vmatmul.msk.f32.gmra.mxu1 %vm65_vm0, %v1845_v33 }
 0x16b   :  { %3051 = vst [vmem:[#allocation2_spill] sm:$0xff] %v2424_v47  ;;  %1861 = vmatmul.msk.f32.gmra.mxu0 %vm65_vm0, %v1845_v33  ;;  %v2445_v33 = vpop.f32.mrf.mxu3 }
 0x16f   :  { %v241_v51 = vpop.f32.mrf.mxu1 }
 0x170   :  { %v176_v7 = vpop.f32.mrf.mxu0  ;;  %v2435_v19 = vadd.f32 %v419_v43, %v241_v51  ;;  %v988_v43 = vld [vmem:[%s3047_s4] sm:$0x3] }
 0x171   :  { %v2437_v24 = vadd.f32 %v354_v44, %v176_v7  ;;  %v2450_v44 = vpop.f32.mrf.mxu2  ;;  %v2454_v60 = vperm.slane %v988_v43, 0 }
 0x172   :  { %3052 = vst [vmem:[#allocation3_spill] sm:$0xff] %v2435_v19  ;;  %1878 = vmatmul.msk.f32.gmra.mxu1 %vm65_vm0, %v1846_v59 }
 0x173   :  { %3053 = vst [vmem:[#allocation4_spill] sm:$0xff] %v2437_v24  ;;  %1862 = vmatmul.msk.f32.gmra.mxu0 %vm65_vm0, %v1846_v59  ;;  %v2452_v24 = vperm.slane %v988_v43, 1 }
 0x177   :  { %v577_v31 = vpop.f32.mrf.mxu1 }
 0x178   :  { %v626_v34 = vadd.f32 %v577_v31, %v375_v28  ;;  %v512_v47 = vpop.f32.mrf.mxu0  ;;  %v313_v31 = vadd.f32 %v2185_v50, %v2247_v5 }
 0x179   :  { %v625_v51 = vadd.f32 %v512_v47, %v310_v21 }
 0x17a   :  { %v861_v7 = vadd.f32 %v812_v40, %v626_v34 }
 0x17b   :  { %v860_v59 = vadd.f32 %v747_v42, %v625_v51 }
 0x17c   :  { %vm893_vm4 = vcmp.gt.f32.partialorder %v861_v7, 0.0  ;;  %v925_v45 = vmul.f32 2.498, %v861_v7 }
 0x17d   :  { %vm892_vm5 = vcmp.gt.f32.partialorder %v860_v59, 0.0  ;;  %v924_v46 = vmul.f32 2.498, %v860_v59 }
 0x17e   :  { %v2458_v28 = vsel %vm893_vm4, %v861_v7, %v925_v45  ;;  %v2470_v7 = vpop.f32.mrf.mxu3 }
 0x17f   :  { %v2462_v47 = vsel %vm892_vm5, %v860_v59, %v924_v46  ;;  %v580_v40 = vpop.f32.mrf.mxu1  ;;  %v995_v42 = vmul.f32 %v2452_v24, %v2458_v28  ;;  %v2473_v59 = vpop.f32.mrf.mxu2 }
 0x180   :  { %v628_v21 = vadd.f32 %v580_v40, %v378_v63  ;;  %v515_v34 = vpop.f32.mrf.mxu0  ;;  %v994_v43 = vmul.f32 %v2454_v60, %v2462_v47 }
 0x181   :  { %v627_v51 = vadd.f32 %v515_v34, %v313_v31  ;;  %v1027_v49 = vsel %vm1026_vm6, %v995_v42, 0.0  ;;  %v1092_v2 = vmul.f32 %v995_v42, %v2458_v28  ;;  %v381_v42 = vadd.f32 %v2197_v53, %v2258_v8 }
 0x182   :  { %v863_v45 = vadd.f32 %v815_v48, %v628_v21  ;;  %v1028_v50 = vadd.f32 %v1027_v49, %v994_v43  ;;  %v1091_v5 = vmul.f32 %v994_v43, %v2462_v47  ;;  %v316_v48 = vadd.f32 %v2199_v54, %v2265_v11 }
 0x183   :  { %v862_v46 = vadd.f32 %v750_v55, %v627_v51  ;;  %v1123_v63 = vsel %vm1026_vm6, %v1092_v2, 0.0 }
 0x184   :  { %vm895_vm7 = vcmp.gt.f32.partialorder %v863_v45, 0.0  ;;  %v927_v40 = vmul.f32 2.498, %v863_v45  ;;  %1029 = vadd.xlane.f32.xlu1 %v1028_v50  ;;  %v1124_v19 = vadd.f32 %v1123_v63, %v1091_v5 }
 0x185   :  { %vm894_vm8 = vcmp.gt.f32.partialorder %v862_v46, 0.0  ;;  %v926_v31 = vmul.f32 2.498, %v862_v46 }
 0x186   :  { %v2478_v34 = vsel %vm895_vm7, %v863_v45, %v927_v40  ;;  %1125 = vadd.xlane.f32.xlu2 %v1124_v19  ;;  %v2494_v5 = vpop.f32.mrf.mxu3 }
 0x187   :  { %v2482_v21 = vsel %vm894_vm8, %v862_v46, %v926_v31  ;;  %v583_v55 = vpop.f32.mrf.mxu1  ;;  %v997_v43 = vmul.f32 %v2452_v24, %v2478_v34  ;;  %v2496_v31 = vpop.f32.mrf.mxu2 }
 0x188   :  { %v630_v51 = vadd.f32 %v583_v55, %v381_v42  ;;  %v518_v49 = vpop.f32.mrf.mxu0  ;;  %v996_v2 = vmul.f32 %v2454_v60, %v2482_v21 }
 0x189   :  { %v629_v50 = vadd.f32 %v518_v49, %v316_v48  ;;  %v1094_v53 = vmul.f32 %v997_v43, %v2478_v34  ;;  %v1031_v8 = vsel %vm1026_vm6, %v997_v43, 0.0  ;;  %v384_v48 = vadd.f32 %v2211_v57, %v2276_v14 }
 0x18a   :  { %v865_v19 = vadd.f32 %v2428_v3, %v630_v51  ;;  %v1093_v54 = vmul.f32 %v996_v2, %v2482_v21  ;;  %v1032_v40 = vadd.f32 %v1031_v8, %v996_v2 }
 0x18b   :  { %v864_v11 = vadd.f32 %v2430_v13, %v629_v50  ;;  %v1127_v45 = vsel %vm1026_vm6, %v1094_v53, 0.0  ;;  %v319_v13 = vadd.f32 %v2213_v58, %v2283_v17 }
 0x18c   :  { %vm897_vm9 = vcmp.gt.f32.partialorder %v865_v19, 0.0  ;;  %v929_v46 = vmul.f32 2.498, %v865_v19  ;;  %v1128_v63 = vadd.f32 %v1127_v45, %v1093_v54 }
 0x18d   :  { %vm896_vm10 = vcmp.gt.f32.partialorder %v864_v11, 0.0  ;;  %v928_v42 = vmul.f32 2.498, %v864_v11 }
 0x18e   :  { %v2500_v3 = vsel %vm897_vm9, %v865_v19, %v929_v46  ;;  %1129 = vadd.xlane.f32.xlu0 %v1128_v63  ;;  %1033 = vadd.xlane.f32.xlu2 %v1032_v40  ;;  %v2516_v63 = vpop.f32.mrf.mxu3  ;;  %v387_v40 = vadd.f32 %v2227_v62, %v2294_v20 }
 0x18f   :  { %v2504_v55 = vsel %vm896_vm10, %v864_v11, %v928_v42  ;;  %v586_v43 = vpop.f32.mrf.mxu1  ;;  %v999_v51 = vmul.f32 %v2452_v24, %v2500_v3 }
 0x190   :  { %v632_v49 = vadd.f32 %v586_v43, %v384_v48  ;;  %v521_v2 = vpop.f32.mrf.mxu0  ;;  %v998_v50 = vmul.f32 %v2454_v60, %v2504_v55 }
 0x191   :  { %v631_v53 = vadd.f32 %v521_v2, %v319_v13  ;;  %v1035_v57 = vsel %vm1026_vm6, %v999_v51, 0.0  ;;  %v1096_v14 = vmul.f32 %v999_v51, %v2500_v3 }
 0x192   :  { %v867_v8 = vadd.f32 %v2445_v33, %v632_v49  ;;  %v1095_v58 = vmul.f32 %v998_v50, %v2504_v55  ;;  %v1036_v11 = vadd.f32 %v1035_v57, %v998_v50  ;;  %v2522_v33 = vpop.f32.mrf.mxu2 }
 0x193   :  { %v866_v17 = vadd.f32 %v2450_v44, %v631_v53  ;;  %v1131_v19 = vsel %vm1026_vm6, %v1096_v14, 0.0  ;;  %v322_v44 = vadd.f32 %v2231_v0, %v2299_v23 }
 0x194   :  { %vm899_vm11 = vcmp.gt.f32.partialorder %v867_v8, 0.0  ;;  %v931_v54 = vmul.f32 2.498, %v867_v8  ;;  %v1132_v45 = vadd.f32 %v1131_v19, %v1095_v58  ;;  %v390_v19 = vadd.f32 %v2245_v4, %v2308_v26 }
 0x195   :  { %vm898_vm12 = vcmp.gt.f32.partialorder %v866_v17, 0.0  ;;  %v930_v46 = vmul.f32 2.498, %v866_v17 }
 0x196   :  { %v2520_v42 = vsel %vm899_vm11, %v867_v8, %v931_v54  ;;  %1037 = vadd.xlane.f32.xlu2 %v1036_v11  ;;  %1133 = vadd.xlane.f32.xlu1 %v1132_v45 }
 0x197   :  { %v2526_v48 = vsel %vm898_vm12, %v866_v17, %v930_v46  ;;  %v589_v13 = vpop.f32.mrf.mxu1  ;;  %v1001_v43 = vmul.f32 %v2452_v24, %v2520_v42  ;;  %v833_v46 = vpop.f32.mrf.mxu3 }
 0x198   :  { %v634_v51 = vadd.f32 %v589_v13, %v387_v40  ;;  %v524_v49 = vpop.f32.mrf.mxu0  ;;  %v1000_v62 = vmul.f32 %v2454_v60, %v2526_v48 }
 0x199   :  { %v633_v20 = vadd.f32 %v524_v49, %v322_v44  ;;  %v1039_v2 = vsel %vm1026_vm6, %v1001_v43, 0.0  ;;  %v1098_v50 = vmul.f32 %v1001_v43, %v2520_v42 }
 0x19a   :  { %v869_v53 = vadd.f32 %v2470_v7, %v634_v51  ;;  %v1040_v57 = vadd.f32 %v1039_v2, %v1000_v62  ;;  %v1097_v0 = vmul.f32 %v1000_v62, %v2526_v48  ;;  %v325_v7 = vadd.f32 %v2249_v6, %v2313_v29  ;;  %v768_v43 = vpop.f32.mrf.mxu2 }
 0x19b   :  { %v868_v23 = vadd.f32 %v2473_v59, %v633_v20  ;;  %v1135_v14 = vsel %vm1026_vm6, %v1098_v50, 0.0 }
 0x19c   :  { %vm901_vm13 = vcmp.gt.f32.partialorder %v869_v53, 0.0  ;;  %v933_v8 = vmul.f32 2.498, %v869_v53  ;;  %1041 = vadd.xlane.f32.xlu0 %v1040_v57  ;;  %v1136_v58 = vadd.f32 %v1135_v14, %v1097_v0  ;;  %v393_v57 = vadd.f32 %v2263_v10, %v2322_v32 }
 0x19d   :  { %vm900_vm14 = vcmp.gt.f32.partialorder %v868_v23, 0.0  ;;  %v932_v17 = vmul.f32 2.498, %v868_v23 }
 0x19e   :  { %v2540_v54 = vsel %vm901_vm13, %v869_v53, %v933_v8  ;;  %1137 = vadd.xlane.f32.xlu2 %v1136_v58 }
 0x19f   :  { %v2544_v11 = vsel %vm900_vm14, %v868_v23, %v932_v17  ;;  %v592_v59 = vpop.f32.mrf.mxu1  ;;  %v1003_v45 = vmul.f32 %v2452_v24, %v2540_v54 }
 0x1a0   :  { %v636_v40 = vadd.f32 %v592_v59, %v390_v19  ;;  %v527_v44 = vpop.f32.mrf.mxu0  ;;  %v1002_v13 = vmul.f32 %v2454_v60, %v2544_v11 }
 0x1a1   :  { %v635_v4 = vadd.f32 %v527_v44, %v325_v7  ;;  %v1100_v26 = vmul.f32 %v1003_v45, %v2540_v54  ;;  %v1043_v51 = vsel %vm1026_vm6, %v1003_v45, 0.0  ;;  %v836_v7 = vpop.f32.mrf.mxu3 }
 0x1a2   :  { %v871_v6 = vadd.f32 %v2494_v5, %v636_v40  ;;  %v1099_v29 = vmul.f32 %v1002_v13, %v2544_v11  ;;  %v1044_v50 = vadd.f32 %v1043_v51, %v1002_v13  ;;  %v328_v5 = vadd.f32 %v2267_v12, %v2327_v35  ;;  %v771_v35 = vpop.f32.mrf.mxu2 }
 0x1a3   :  { %v870_v49 = vadd.f32 %v2496_v31, %v635_v4  ;;  %v1139_v62 = vsel %vm1026_vm6, %v1100_v26, 0.0  ;;  %v396_v51 = vadd.f32 %v2281_v16, %v2336_v38 }
 0x1a4   :  { %vm903_vm15 = vcmp.gt.f32.partialorder %v871_v6, 0.0  ;;  %v935_v20 = vmul.f32 2.498, %v871_v6  ;;  %v1140_v2 = vadd.f32 %v1139_v62, %v1099_v29 }
 0x1a5   :  { %vm902_vm0 = vcmp.gt.f32.partialorder %v870_v49, 0.0  ;;  %v934_v53 = vmul.f32 2.498, %v870_v49 }
 0x1a6   :  { %v2558_v0 = vsel %vm903_vm15, %v871_v6, %v935_v20  ;;  %1141 = vadd.xlane.f32.xlu0 %v1140_v2  ;;  %1045 = vadd.xlane.f32.xlu2 %v1044_v50 }
 0x1a7   :  { %v2562_v23 = vsel %vm902_vm0, %v870_v49, %v934_v53  ;;  %v595_v31 = vpop.f32.mrf.mxu1  ;;  %v1005_v14 = vmul.f32 %v2452_v24, %v2558_v0 }
 0x1a8   :  { %v638_v8 = vadd.f32 %v595_v31, %v393_v57  ;;  %v530_v58 = vpop.f32.mrf.mxu0  ;;  %v1004_v17 = vmul.f32 %v2454_v60, %v2562_v23 }
 0x1a9   :  { %v637_v19 = vadd.f32 %v530_v58, %v328_v5  ;;  %v1047_v10 = vsel %vm1026_vm6, %v1005_v14, 0.0  ;;  %v1102_v32 = vmul.f32 %v1005_v14, %v2558_v0  ;;  %v839_v57 = vpop.f32.mrf.mxu3 }
 0x1aa   :  { %v873_v59 = vadd.f32 %v2516_v63, %v638_v8  ;;  %v1101_v12 = vmul.f32 %v1004_v17, %v2562_v23  ;;  %v1048_v13 = vadd.f32 %v1047_v10, %v1004_v17  ;;  %v331_v63 = vadd.f32 %v2285_v18, %v2341_v41  ;;  %v774_v41 = vpop.f32.mrf.mxu2 }
 0x1ab   :  { %v872_v45 = vadd.f32 %v2522_v33, %v637_v19  ;;  %v1143_v40 = vsel %vm1026_vm6, %v1102_v32, 0.0 }
 0x1ac   :  { %vm905_vm1 = vcmp.gt.f32.partialorder %v873_v59, 0.0  ;;  %v937_v44 = vmul.f32 2.498, %v873_v59  ;;  %v1144_v4 = vadd.f32 %v1143_v40, %v1101_v12 }
 0x1ad   :  { %vm904_vm2 = vcmp.gt.f32.partialorder %v872_v45, 0.0  ;;  %v936_v26 = vmul.f32 2.498, %v872_v45 }
 0x1ae   :  { %v2576_v6 = vsel %vm905_vm1, %v873_v59, %v937_v44  ;;  %1049 = vadd.xlane.f32.xlu2 %v1048_v13  ;;  %1145 = vadd.xlane.f32.xlu1 %v1144_v4 }
 0x1af   :  { %v2580_v29 = vsel %vm904_vm2, %v872_v45, %v936_v26  ;;  %v598_v33 = vpop.f32.mrf.mxu1  ;;  %v1007_v49 = vmul.f32 %v2452_v24, %v2576_v6 }
 0x1b0   :  { %v640_v62 = vadd.f32 %v598_v33, %v396_v51  ;;  %v533_v20 = vpop.f32.mrf.mxu0  ;;  %v1006_v2 = vmul.f32 %v2454_v60, %v2580_v29 }
 0x1b1   :  { %v639_v50 = vadd.f32 %v533_v20, %v331_v63  ;;  %v1051_v16 = vsel %vm1026_vm6, %v1007_v49, 0.0  ;;  %v1104_v14 = vmul.f32 %v1007_v49, %v2576_v6  ;;  %v842_v33 = vpop.f32.mrf.mxu3 }
 0x1b2   :  { %v875_v38 = vadd.f32 %v833_v46, %v640_v62  ;;  %v1052_v18 = vadd.f32 %v1051_v16, %v1006_v2  ;;  %v1103_v32 = vmul.f32 %v1006_v2, %v2580_v29 }
 0x1b3   :  { %v874_v53 = vadd.f32 %v768_v43, %v639_v50  ;;  %v1147_v45 = vsel %vm1026_vm6, %v1104_v14, 0.0 }
 0x1b4   :  { %vm907_vm3 = vcmp.gt.f32.partialorder %v875_v38, 0.0  ;;  %v939_v5 = vmul.f32 2.498, %v875_v38  ;;  %v1148_v51 = vadd.f32 %v1147_v45, %v1103_v32 }
 0x1b5   :  { %vm906_vm4 = vcmp.gt.f32.partialorder %v874_v53, 0.0  ;;  %v938_v31 = vmul.f32 2.498, %v874_v53 }
 0x1b6   :  { %v2588_v8 = vsel %vm907_vm3, %v875_v38, %v939_v5  ;;  %1053 = vadd.xlane.f32.xlu2 %v1052_v18 }
 0x1b7   :  { %v2590_v58 = vsel %vm906_vm4, %v874_v53, %v938_v31  ;;  %v601_v17 = vpop.f32.mrf.mxu1  ;;  %v1009_v19 = vmul.f32 %v2452_v24, %v2588_v8 }
 0x1b8   :  { %v642_v46 = vadd.f32 %v601_v17, %v2353_v52  ;;  %v536_v43 = vpop.f32.mrf.mxu0  ;;  %v1008_v10 = vmul.f32 %v2454_v60, %v2590_v58 }
 0x1b9   :  { %v641_v59 = vadd.f32 %v536_v43, %v2355_v56  ;;  %v1106_v12 = vmul.f32 %v1009_v19, %v2588_v8  ;;  %v777_v56 = vpop.f32.mrf.mxu2  ;;  %v1055_v38 = vsel %vm1026_vm6, %v1009_v19, 0.0 }
 0x1ba   :  { %v877_v40 = vadd.f32 %v836_v7, %v642_v46  ;;  %v1105_v44 = vmul.f32 %v1008_v10, %v2590_v58  ;;  %v1056_v46 = vadd.f32 %v1055_v38, %v1008_v10 }
 0x1bb   :  { %v876_v13 = vadd.f32 %v771_v35, %v641_v59  ;;  %v1151_v4 = vsel %vm1026_vm6, %v1106_v12, 0.0  ;;  %v845_v59 = vpop.f32.mrf.mxu3 }
 0x1bc   :  { %vm909_vm5 = vcmp.gt.f32.partialorder %v877_v40, 0.0  ;;  %v941_v52 = vmul.f32 2.498, %v877_v40  ;;  %v1152_v26 = vadd.f32 %v1151_v4, %v1105_v44 }
 0x1bd   :  { %vm908_vm7 = vcmp.gt.f32.partialorder %v876_v13, 0.0  ;;  %v940_v63 = vmul.f32 2.498, %v876_v13 }
 0x1be   :  { %v2603_v49 = vsel %vm909_vm5, %v877_v40, %v941_v52  ;;  %1153 = vadd.xlane.f32.xlu0 %v1152_v26  ;;  %1149 = vadd.xlane.f32.xlu2 %v1148_v51 }
 0x1bf   :  { %v2605_v62 = vsel %vm908_vm7, %v876_v13, %v940_v63  ;;  %v604_v7 = vpop.f32.mrf.mxu1  ;;  %v1011_v35 = vmul.f32 %v2452_v24, %v2603_v49 }
 0x1c0   :  { %v644_v20 = vadd.f32 %v604_v7, %v2367_v9  ;;  %v539_v2 = vpop.f32.mrf.mxu0  ;;  %v1010_v50 = vmul.f32 %v2454_v60, %v2605_v62 }
 0x1c1   :  { %v643_v16 = vadd.f32 %v539_v2, %v2369_v15  ;;  %v1108_v53 = vmul.f32 %v1011_v35, %v2603_v49  ;;  %v780_v45 = vpop.f32.mrf.mxu2  ;;  %v1059_v44 = vsel %vm1026_vm6, %v1011_v35, 0.0 }
 0x1c2   :  { %v879_v5 = vadd.f32 %v839_v57, %v644_v20  ;;  %v1107_v18 = vmul.f32 %v1010_v50, %v2605_v62  ;;  %v1060_v51 = vadd.f32 %v1059_v44, %v1010_v50 }
 0x1c3   :  { %v878_v31 = vadd.f32 %v774_v41, %v643_v16  ;;  %v1155_v14 = vsel %vm1026_vm6, %v1108_v53, 0.0 }
 0x1c4   :  { %vm911_vm8 = vcmp.gt.f32.partialorder %v879_v5, 0.0  ;;  %v943_v17 = vmul.f32 2.498, %v879_v5  ;;  %v1156_v9 = vadd.f32 %v1155_v14, %v1107_v18  ;;  %v848_v18 = vpop.f32.mrf.mxu3 }
 0x1c5   :  { %vm910_vm9 = vcmp.gt.f32.partialorder %v878_v31, 0.0  ;;  %v942_v43 = vmul.f32 2.498, %v878_v31 }
 0x1c6   :  { %v2617_v32 = vsel %vm911_vm8, %v879_v5, %v943_v17  ;;  %1057 = vadd.xlane.f32.xlu2 %v1056_v46  ;;  %1157 = vadd.xlane.f32.xlu1 %v1156_v9 }
 0x1c7   :  { %v2619_v15 = vsel %vm910_vm9, %v878_v31, %v942_v43  ;;  %v607_v19 = vpop.f32.mrf.mxu1  ;;  %v1013_v57 = vmul.f32 %v2452_v24, %v2617_v32 }
 0x1c8   :  { %v646_v41 = vadd.f32 %v607_v19, %v2381_v27  ;;  %v542_v12 = vpop.f32.mrf.mxu0  ;;  %v1012_v10 = vmul.f32 %v2454_v60, %v2619_v15 }
 0x1c9   :  { %v645_v40 = vadd.f32 %v542_v12, %v2383_v30  ;;  %v1063_v13 = vsel %vm1026_vm6, %v1013_v57, 0.0  ;;  %v1110_v27 = vmul.f32 %v1013_v57, %v2617_v32  ;;  %v783_v17 = vpop.f32.mrf.mxu2 }
 0x1ca   :  { %v881_v4 = vadd.f32 %v842_v33, %v646_v41  ;;  %v1064_v63 = vadd.f32 %v1063_v13, %v1012_v10  ;;  %v1109_v16 = vmul.f32 %v1012_v10, %v2619_v15 }
 0x1cb   :  { %v880_v52 = vadd.f32 %v777_v56, %v645_v40  ;;  %v1159_v5 = vsel %vm1026_vm6, %v1110_v27, 0.0 }
 0x1cc   :  { %vm913_vm10 = vcmp.gt.f32.partialorder %v881_v4, 0.0  ;;  %v945_v26 = vmul.f32 2.498, %v881_v4  ;;  %v1160_v19 = vadd.f32 %v1159_v5, %v1109_v16 }
 0x1cd   :  { %vm912_vm11 = vcmp.gt.f32.partialorder %v880_v52, 0.0  ;;  %v944_v7 = vmul.f32 2.498, %v880_v52 }
 0x1ce   :  { %v2630_v20 = vsel %vm913_vm10, %v881_v4, %v945_v26  ;;  %1061 = vadd.xlane.f32.xlu2 %v1060_v51  ;;  %1065 = vadd.xlane.f32.xlu1 %v1064_v63 }
 0x1cf   :  { %v2632_v2 = vsel %vm912_vm11, %v880_v52, %v944_v7  ;;  %v610_v30 = vpop.f32.mrf.mxu1  ;;  %v1015_v35 = vmul.f32 %v2452_v24, %v2630_v20 }
 0x1d0   :  { %v648_v33 = vadd.f32 %v610_v30, %v2395_v36  ;;  %v545_v56 = vpop.f32.mrf.mxu0  ;;  %v1014_v50 = vmul.f32 %v2454_v60, %v2632_v2 }
 0x1d1   :  { %v647_v38 = vadd.f32 %v545_v56, %v2397_v39  ;;  %v1112_v53 = vmul.f32 %v1015_v35, %v2630_v20  ;;  %v1067_v44 = vsel %vm1026_vm6, %v1015_v35, 0.0  ;;  %v786_v16 = vpop.f32.mrf.mxu2 }
 0x1d2   :  { %v883_v31 = vadd.f32 %v845_v59, %v648_v33  ;;  %v1111_v14 = vmul.f32 %v1014_v50, %v2632_v2  ;;  %v1068_v7 = vadd.f32 %v1067_v44, %v1014_v50 }
 0x1d3   :  { %v882_v46 = vadd.f32 %v780_v45, %v647_v38  ;;  %v1163_v36 = vsel %vm1026_vm6, %v1112_v53, 0.0 }
 0x1d4   :  { %vm915_vm12 = vcmp.gt.f32.partialorder %v883_v31, 0.0  ;;  %v947_v9 = vmul.f32 2.498, %v883_v31  ;;  %v1164_v43 = vadd.f32 %v1163_v36, %v1111_v14 }
 0x1d5   :  { %vm914_vm13 = vcmp.gt.f32.partialorder %v882_v46, 0.0  ;;  %v946_v57 = vmul.f32 2.498, %v882_v46 }
 0x1d6   :  { %v2645_v41 = vsel %vm915_vm12, %v883_v31, %v947_v9  ;;  %1165 = vadd.xlane.f32.xlu0 %v1164_v43  ;;  %1161 = vadd.xlane.f32.xlu2 %v1160_v19 }
 0x1d7   :  { %v2647_v39 = vsel %vm914_vm13, %v882_v46, %v946_v57  ;;  %v613_v12 = vpop.f32.mrf.mxu1  ;;  %v1017_v59 = vmul.f32 %v2452_v24, %v2645_v41 }
 0x1d8   :  { %v650_v10 = vadd.f32 %v613_v12, %v2404_v61  ;;  %v548_v45 = vpop.f32.mrf.mxu0  ;;  %v1016_v40 = vmul.f32 %v2454_v60, %v2647_v39  ;;  %v851_v61 = vpop.f32.mrf.mxu3 }
 0x1d9   :  { %v649_v13 = vadd.f32 %v548_v45, %v2406_v1  ;;  %v1071_v4 = vsel %vm1026_vm6, %v1017_v59, 0.0  ;;  %v1114_v52 = vmul.f32 %v1017_v59, %v2645_v41 }
 0x1da   :  { %v885_v26 = vadd.f32 %v848_v18, %v650_v10  ;;  %v1113_v51 = vmul.f32 %v1016_v40, %v2647_v39  ;;  %v1072_v33 = vadd.f32 %v1071_v4, %v1016_v40 }
 0x1db   :  { %v884_v63 = vadd.f32 %v783_v17, %v649_v13  ;;  %v1167_v27 = vsel %vm1026_vm6, %v1114_v52, 0.0 }
 0x1dc   :  { %vm917_vm14 = vcmp.gt.f32.partialorder %v885_v26, 0.0  ;;  %v949_v30 = vmul.f32 2.498, %v885_v26  ;;  %v1168_v56 = vadd.f32 %v1167_v27, %v1113_v51  ;;  %v3054_v51 = vld [vmem:[#allocation2_spill] sm:$0xff] }
 0x1dd   :  { %vm916_vm15 = vcmp.gt.f32.partialorder %v884_v63, 0.0  ;;  %v948_v35 = vmul.f32 2.498, %v884_v63 }
 0x1de   :  { %v2660_v1 = vsel %vm917_vm14, %v885_v26, %v949_v30  ;;  %1073 = vadd.xlane.f32.xlu0 %v1072_v33  ;;  %1069 = vadd.xlane.f32.xlu2 %v1068_v7 }
 0x1df   :  { %v2662_v38 = vsel %vm916_vm15, %v884_v63, %v948_v35  ;;  %1169 = vadd.xlane.f32.xlu1 %v1168_v56  ;;  %v616_v53 = vpop.f32.mrf.mxu1  ;;  %v1019_v50 = vmul.f32 %v2452_v24, %v2660_v1 }
 0x1e0   :  { %v652_v5 = vadd.f32 %v616_v53, %v2413_v22  ;;  %v551_v18 = vpop.f32.mrf.mxu0  ;;  %v1018_v31 = vmul.f32 %v2454_v60, %v2662_v38  ;;  %v854_v10 = vpop.f32.mrf.mxu3 }
 0x1e1   :  { %v651_v14 = vadd.f32 %v551_v18, %v2415_v25  ;;  %v1116_v17 = vmul.f32 %v1019_v50, %v2660_v1  ;;  %v1075_v9 = vsel %vm1026_vm6, %v1019_v50, 0.0  ;;  %v789_v25 = vpop.f32.mrf.mxu2 }
 0x1e2   :  { %v887_v46 = vadd.f32 %v851_v61, %v652_v5  ;;  %v1115_v36 = vmul.f32 %v1018_v31, %v2662_v38  ;;  %v1076_v59 = vadd.f32 %v1075_v9, %v1018_v31 }
 0x1e3   :  { %v886_v43 = vadd.f32 %v786_v16, %v651_v14  ;;  %v1171_v19 = vsel %vm1026_vm6, %v1116_v17, 0.0  ;;  %v3055_v17 = vld [vmem:[#allocation3_spill] sm:$0xff] }
 0x1e4   :  { %vm919_vm0 = vcmp.gt.f32.partialorder %v887_v46, 0.0  ;;  %v951_v57 = vmul.f32 2.498, %v887_v46  ;;  %v1172_v12 = vadd.f32 %v1171_v19, %v1115_v36  ;;  %v3056_v19 = vld [vmem:[#allocation4_spill] sm:$0xff] }
 0x1e5   :  { %vm918_vm1 = vcmp.gt.f32.partialorder %v886_v43, 0.0  ;;  %v950_v22 = vmul.f32 2.498, %v886_v43 }
 0x1e6   :  { %v2674_v45 = vsel %vm919_vm0, %v887_v46, %v951_v57  ;;  %1173 = vadd.xlane.f32.xlu2 %v1172_v12 }
 0x1e7   :  { %v2676_v40 = vsel %vm918_vm1, %v886_v43, %v950_v22  ;;  %1077 = vadd.xlane.f32.xlu1 %v1076_v59  ;;  %v619_v44 = vpop.f32.mrf.mxu1  ;;  %v1021_v13 = vmul.f32 %v2452_v24, %v2674_v45 }
 0x1e8   :  { %v654_v4 = vadd.f32 %v619_v44, %v2422_v37  ;;  %v554_v52 = vpop.f32.mrf.mxu0  ;;  %v1020_v26 = vmul.f32 %v2454_v60, %v2676_v40  ;;  %v857_v31 = vpop.f32.mrf.mxu3 }
 0x1e9   :  { %v653_v63 = vadd.f32 %v554_v52, %v3054_v51  ;;  %v1118_v7 = vmul.f32 %v1021_v13, %v2674_v45  ;;  %v1079_v27 = vsel %vm1026_vm6, %v1021_v13, 0.0  ;;  %v792_v9 = vpop.f32.mrf.mxu2 }
 0x1ea   :  { %v889_v61 = vadd.f32 %v854_v10, %v654_v4  ;;  %v1117_v30 = vmul.f32 %v1020_v26, %v2676_v40  ;;  %v1080_v37 = vadd.f32 %v1079_v27, %v1020_v26  ;;  %v1984_v26 = vmov 0  }
 0x1eb   :  { %v888_v33 = vadd.f32 %v789_v25, %v653_v63  ;;  %v1175_v56 = vsel %vm1026_vm6, %v1118_v7, 0.0  ;;  %1946 = vset.pattern.permute.xlu0 %v1984_v26  ;;  %1947 = vset.pattern.permute.xlu1 %v1984_v26 }
 0x1ec   :  { %vm921_vm2 = vcmp.gt.f32.partialorder %v889_v61, 0.0  ;;  %v953_v16 = vmul.f32 2.498, %v889_v61  ;;  %v1176_v35 = vadd.f32 %v1175_v56, %v1117_v30  ;;  %1948 = vset.pattern.permute.xlu2 %v1984_v26 }
 0x1ed   :  { %vm920_vm3 = vcmp.gt.f32.partialorder %v888_v33, 0.0  ;;  %v952_v53 = vmul.f32 2.498, %v888_v33 }
 0x1ee   :  { %v2688_v50 = vsel %vm921_vm2, %v889_v61, %v953_v16  ;;  %1177 = vadd.xlane.f32.xlu0 %v1176_v35  ;;  %1081 = vadd.xlane.f32.xlu2 %v1080_v37 }
 0x1ef   :  { %v2690_v5 = vsel %vm920_vm3, %v888_v33, %v952_v53  ;;  %v622_v18 = vpop.f32.mrf.mxu1  ;;  %v1023_v14 = vmul.f32 %v2452_v24, %v2688_v50 }
 0x1f0   :  { %v656_v46 = vadd.f32 %v622_v18, %v3055_v17  ;;  %v557_v36 = vpop.f32.mrf.mxu0  ;;  %v1022_v43 = vmul.f32 %v2454_v60, %v2690_v5 }
 0x1f1   :  { %v655_v57 = vadd.f32 %v557_v36, %v3056_v19  ;;  %v1083_v12 = vsel %vm1026_vm6, %v1023_v14, 0.0  ;;  %v1120_v22 = vmul.f32 %v1023_v14, %v2688_v50 }
 0x1f2   :  { %v891_v59 = vadd.f32 %v857_v31, %v656_v46  ;;  %v1119_v10 = vmul.f32 %v1022_v43, %v2690_v5  ;;  %v1084_v4 = vadd.f32 %v1083_v12, %v1022_v43 }
 0x1f3   :  { %v890_v25 = vadd.f32 %v792_v9, %v655_v57  ;;  %v1179_v44 = vsel %vm1026_vm6, %v1120_v22, 0.0 }
 0x1f4   :  { %vm923_vm4 = vcmp.gt.f32.partialorder %v891_v59, 0.0  ;;  %v955_v13 = vmul.f32 2.498, %v891_v59  ;;  %v1180_v52 = vadd.f32 %v1179_v44, %v1119_v10 }
 0x1f5   :  { %vm922_vm5 = vcmp.gt.f32.partialorder %v890_v25, 0.0  ;;  %v954_v51 = vmul.f32 2.498, %v890_v25 }
 0x1f6   :  { %v2702_v63 = vsel %vm923_vm4, %v891_v59, %v955_v13  ;;  %1085 = vadd.xlane.f32.xlu0 %v1084_v4  ;;  %1181 = vadd.xlane.f32.xlu1 %v1180_v52 }
 0x1f7   :  { %v2704_v7 = vsel %vm922_vm5, %v890_v25, %v954_v51  ;;  %v1030_v27 = vpop.xlane.xlu1 %1029  ;;  %v1025_v61 = vmul.f32 %v2452_v24, %v2702_v63 }
 0x1f8   :  { %v1187_v30 = vmul.f32 %v1030_v27, %v1030_v27  ;;  %v1024_v33 = vmul.f32 %v2454_v60, %v2704_v7 }
 0x1f9   :  { %v1126_v56 = vpop.xlane.xlu2 %1125  ;;  %v1122_v16 = vmul.f32 %v1025_v61, %v2702_v63  ;;  %v1087_v35 = vsel %vm1026_vm6, %v1025_v61, 0.0  ;;  %v1411_v61 = vld [vmem:[%s3048_s2] sm:$0xff] }
 0x1fa   :  { %v1203_v37 = vsub.f32 %v1126_v56, %v1187_v30  ;;  %v1121_v53 = vmul.f32 %v1024_v33, %v2704_v7  ;;  %v1088_v17 = vadd.f32 %v1087_v35, %v1024_v33 }
 0x1fb   :  { %v1183_v18 = vsel %vm1026_vm6, %v1122_v16, 0.0 }
 0x1fc   :  { %v1219_v31 = vmax.f32 %v1203_v37, 0.0  ;;  %v1184_v14 = vadd.f32 %v1183_v18, %v1121_v53 }
 0x1fe   :  { %v1235_v46 = vadd.f32 1e-05, %v1219_v31  ;;  %1185 = vadd.xlane.f32.xlu2 %v1184_v14  ;;  %1089 = vadd.xlane.f32.xlu1 %v1088_v17 }
 0x200   :  { %1949 = vrsqrt.f32 %v1235_v46  ;;  %vm1257_vm8 = vweird.f32 %v1235_v46 }
 0x201   :  { %v2714_v24 = vpop.xlane.xlu2 %1033  ;;  %v1130_v36 = vpop.xlane.xlu0 %1129 }
 0x202   :  { %v1188_v60 = vmul.f32 %v2714_v24, %v2714_v24 }
 0x204   :  { %v1204_v9 = vsub.f32 %v1130_v36, %v1188_v60 }
 0x206   :  { %v1950_v43 = vpop.eup %1949  ;;  %v1220_v19 = vmax.f32 %v1204_v9, 0.0  ;;  %v1443_v9 = vld [vmem:[%s3049_s3] sm:$0xff] }
 0x207   :  { %v1252_v57 = vmul.f32 %v1950_v43, %v1235_v46  ;;  %vm1258_vm7 = vweird.f32 %v1950_v43 }
 0x208   :  { %v1236_v12 = vadd.f32 1e-05, %v1220_v19  ;;  %vm1259_vm9 = vmor %vm1257_vm8, %vm1258_vm7 }
 0x209   :  { %v1253_v22 = vmul.f32 %v1950_v43, %v1252_v57  ;;  %v2718_v59 = vpop.xlane.xlu2 %1037  ;;  %v1134_v44 = vpop.xlane.xlu1 %1133 }
 0x20a   :  { %1951 = vrsqrt.f32 %v1236_v12  ;;  %v1189_v10 = vmul.f32 %v2718_v59, %v2718_v59  ;;  %vm1267_vm11 = vweird.f32 %v1236_v12 }
 0x20b   :  { %v1254_v25 = vmul.f32 0.5, %v1253_v22 }
 0x20c   :  { %v1205_v13 = vsub.f32 %v1134_v44, %v1189_v10 }
 0x20d   :  { %v1255_v4 = vsub.f32 1.5, %v1254_v25 }
 0x20e   :  { %v1221_v52 = vmax.f32 %v1205_v13, 0.0 }
 0x20f   :  { %v2722_v26 = vpop.xlane.xlu0 %1041  ;;  %v1256_v51 = vmul.f32 %v1950_v43, %v1255_v4 }
 0x210   :  { %v1952_v30 = vpop.eup %1951  ;;  %v1237_v33 = vadd.f32 1e-05, %v1221_v52  ;;  %v1190_v56 = vmul.f32 %v2722_v26, %v2722_v26 }
 0x211   :  { %v1262_v16 = vmul.f32 %v1952_v30, %v1236_v12  ;;  %v1138_v35 = vpop.xlane.xlu2 %1137  ;;  %v1260_v37 = vsel %vm1259_vm9, %v1950_v43, %v1256_v51  ;;  %vm1268_vm10 = vweird.f32 %v1952_v30  ;;  %v1412_v43 = vld [vmem:[%s3048_s2 + $0x8] sm:$0xff] }
 0x212   :  { %1953 = vrsqrt.f32 %v1237_v33  ;;  %v1206_v53 = vsub.f32 %v1138_v35, %v1190_v56  ;;  %v1427_v18 = vmul.f32 %v1411_v61, %v1260_v37  ;;  %vm1269_vm12 = vmor %vm1267_vm11, %vm1268_vm10  ;;  %vm1277_vm14 = vweird.f32 %v1237_v33 }
 0x213   :  { %v1263_v31 = vmul.f32 %v1952_v30, %v1262_v16 }
 0x214   :  { %v1222_v14 = vmax.f32 %v1206_v53, 0.0  ;;  %1493 = vperm.xlu0 %1946, %v1427_v18   ;;  %v1459_v60 = vmul.f32 %v1427_v18, %v1030_v27  ;;  %v1444_v18 = vld [vmem:[%s3049_s3 + $0x8] sm:$0xff] }
 0x215   :  { %v1264_v17 = vmul.f32 0.5, %v1263_v31 }
 0x216   :  { %v1238_v46 = vadd.f32 1e-05, %v1222_v14  ;;  %v1475_v25 = vsub.f32 %v1443_v9, %v1459_v60 }
 0x217   :  { %v1265_v36 = vsub.f32 1.5, %v1264_v17  ;;  %v1413_v17 = vld [vmem:[%s3048_s2 + $0x10] sm:$0xff] }
 0x218   :  { %v1954_v19 = vpop.eup %1953  ;;  %1955 = vrsqrt.f32 %v1238_v46  ;;  %vm1287_vm1 = vweird.f32 %v1238_v46 }
 0x219   :  { %v1266_v57 = vmul.f32 %v1952_v30, %v1265_v36  ;;  %v1272_v22 = vmul.f32 %v1954_v19, %v1237_v33  ;;  %v2735_v10 = vpop.xlane.xlu2 %1045  ;;  %v1142_v4 = vpop.xlane.xlu0 %1141  ;;  %vm1278_vm13 = vweird.f32 %v1954_v19 }
 0x21a   :  { %v1191_v27 = vmul.f32 %v2735_v10, %v2735_v10  ;;  %vm1279_vm15 = vmor %vm1277_vm14, %vm1278_vm13 }
 0x21b   :  { %v1270_v44 = vsel %vm1269_vm12, %v1952_v30, %v1266_v57  ;;  %v1273_v13 = vmul.f32 %v1954_v19, %v1272_v22 }
 0x21c   :  { %v1428_v52 = vmul.f32 %v1412_v43, %v1270_v44  ;;  %v1207_v51 = vsub.f32 %v1142_v4, %v1191_v27  ;;  %1605 = vperm.xlu0 %1946, %v1475_v25   ;;  %v1414_v44 = vld [vmem:[%s3048_s2 + $0x18] sm:$0xff] }
 0x21d   :  { %v1274_v61 = vmul.f32 0.5, %v1273_v13 }
 0x21e   :  { %v1956_v56 = vpop.eup %1955  ;;  %v1223_v16 = vmax.f32 %v1207_v51, 0.0  ;;  %1498 = vperm.xlu1 %1947, %v1428_v52   ;;  %v1460_v37 = vmul.f32 %v1428_v52, %v2714_v24 }
 0x21f   :  { %v1275_v35 = vsub.f32 1.5, %v1274_v61  ;;  %v1282_v12 = vmul.f32 %v1956_v56, %v1238_v46  ;;  %vm1288_vm0 = vweird.f32 %v1956_v56 }
 0x220   :  { %v1239_v53 = vadd.f32 1e-05, %v1223_v16  ;;  %v1476_v43 = vsub.f32 %v1444_v18, %v1460_v37  ;;  %vm1289_vm2 = vmor %vm1287_vm1, %vm1288_vm0  ;;  %v1445_v16 = vld [vmem:[%s3049_s3 + $0x10] sm:$0xff] }
 0x221   :  { %v1283_v30 = vmul.f32 %v1956_v56, %v1282_v12  ;;  %v2743_v31 = vpop.xlane.xlu2 %1049  ;;  %v1276_v14 = vmul.f32 %v1954_v19, %v1275_v35  ;;  %v1146_v36 = vpop.xlane.xlu1 %1145  ;;  %v1446_v12 = vld [vmem:[%s3049_s3 + $0x18] sm:$0xff] }
 0x222   :  { %1957 = vrsqrt.f32 %v1239_v53  ;;  %v1192_v60 = vmul.f32 %v2743_v31, %v2743_v31  ;;  %vm1297_vm4 = vweird.f32 %v1239_v53 }
 0x223   :  { %v1284_v24 = vmul.f32 0.5, %v1283_v30  ;;  %v1280_v9 = vsel %vm1279_vm15, %v1954_v19, %v1276_v14 }
 0x224   :  { %v1208_v57 = vsub.f32 %v1146_v36, %v1192_v60  ;;  %v1429_v22 = vmul.f32 %v1413_v17, %v1280_v9  ;;  %v1415_v60 = vld [vmem:[%s3048_s2 + $0x20] sm:$0xff] }
 0x225   :  { %v1285_v33 = vsub.f32 1.5, %v1284_v24 }
 0x226   :  { %v1224_v27 = vmax.f32 %v1208_v57, 0.0  ;;  %1610 = vperm.xlu1 %1947, %v1476_v43   ;;  %1503 = vperm.xlu2 %1948, %v1429_v22   ;;  %v1461_v52 = vmul.f32 %v1429_v22, %v2718_v59 }
 0x227   :  { %v1286_v25 = vmul.f32 %v1956_v56, %v1285_v33 }
 0x228   :  { %v1958_v13 = vpop.eup %1957  ;;  %v1240_v4 = vadd.f32 1e-05, %v1224_v27  ;;  %v1477_v37 = vsub.f32 %v1445_v16, %v1461_v52  ;;  %v1447_v27 = vld [vmem:[%s3049_s3 + $0x20] sm:$0xff]  ;;  %v1416_v16 = vld [vmem:[%s3048_s2 + $0x28] sm:$0xff] }
 0x229   :  { %v1292_v19 = vmul.f32 %v1958_v13, %v1239_v53  ;;  %v2754_v51 = vpop.xlane.xlu2 %1053  ;;  %v1290_v61 = vsel %vm1289_vm2, %v1956_v56, %v1286_v25  ;;  %vm1298_vm3 = vweird.f32 %v1958_v13 }
 0x22a   :  { %1959 = vrsqrt.f32 %v1240_v4  ;;  %v1430_v46 = vmul.f32 %v1414_v44, %v1290_v61  ;;  %v1193_v17 = vmul.f32 %v2754_v51, %v2754_v51  ;;  %vm1299_vm5 = vmor %vm1297_vm4, %vm1298_vm3  ;;  %vm1307_vm8 = vweird.f32 %v1240_v4 }
 0x22b   :  { %v1293_v35 = vmul.f32 %v1958_v13, %v1292_v19 }
 0x22c   :  { %v1462_v18 = vmul.f32 %v1430_v46, %v2722_v26 }
 0x22d   :  { %v1294_v30 = vmul.f32 0.5, %v1293_v35 }
 0x22e   :  { %1508 = vperm.xlu1 %1947, %v1430_v46   ;;  %1615 = vperm.xlu2 %1948, %v1477_v37   ;;  %v1478_v59 = vsub.f32 %v1446_v12, %v1462_v18 }
 0x22f   :  { %v1295_v14 = vsub.f32 1.5, %v1294_v30 }
 0x230   :  { %v1960_v56 = vpop.eup %1959  ;;  %1620 = vperm.xlu0 %1946, %v1478_v59  }
 0x231   :  { %v1296_v24 = vmul.f32 %v1958_v13, %v1295_v14  ;;  %v1302_v36 = vmul.f32 %v1960_v56, %v1240_v4  ;;  %v1150_v9 = vpop.xlane.xlu2 %1149  ;;  %vm1308_vm7 = vweird.f32 %v1960_v56  ;;  %v1448_v4 = vld [vmem:[%s3049_s3 + $0x28] sm:$0xff] }
 0x232   :  { %v1209_v26 = vsub.f32 %v1150_v9, %v1193_v17  ;;  %vm1309_vm9 = vmor %vm1307_vm8, %vm1308_vm7 }
 0x233   :  { %v1300_v43 = vsel %vm1299_vm5, %v1958_v13, %v1296_v24  ;;  %v1303_v57 = vmul.f32 %v1960_v56, %v1302_v36 }
 0x234   :  { %v1431_v22 = vmul.f32 %v1415_v60, %v1300_v43  ;;  %v1225_v33 = vmax.f32 %v1209_v26, 0.0 }
 0x235   :  { %v1304_v25 = vmul.f32 0.5, %v1303_v57 }
 0x236   :  { %v1463_v44 = vmul.f32 %v1431_v22, %v2735_v10  ;;  %v1241_v52 = vadd.f32 1e-05, %v1225_v33  ;;  %1513 = vperm.xlu2 %1948, %v1431_v22   ;;  %v1154_v10 = vpop.xlane.xlu0 %1153 }
 0x237   :  { %v1305_v19 = vsub.f32 1.5, %v1304_v25 }
 0x238   :  { %v1479_v53 = vsub.f32 %v1447_v27, %v1463_v44  ;;  %1961 = vrsqrt.f32 %v1241_v52  ;;  %vm1317_vm11 = vweird.f32 %v1241_v52  ;;  %v1417_v27 = vld [vmem:[%s3048_s2 + $0x30] sm:$0xff] }
 0x239   :  { %v2772_v61 = vpop.xlane.xlu2 %1057  ;;  %v1306_v13 = vmul.f32 %v1960_v56, %v1305_v19  ;;  %v1158_v35 = vpop.xlane.xlu1 %1157 }
 0x23a   :  { %v1194_v46 = vmul.f32 %v2772_v61, %v2772_v61  ;;  %1625 = vperm.xlu1 %1947, %v1479_v53  }
 0x23b   :  { %v1310_v12 = vsel %vm1309_vm9, %v1960_v56, %v1306_v13 }
 0x23c   :  { %v1210_v37 = vsub.f32 %v1154_v10, %v1194_v46  ;;  %v1432_v18 = vmul.f32 %v1416_v16, %v1310_v12 }
 0x23e   :  { %v1962_v30 = vpop.eup %1961  ;;  %v1226_v59 = vmax.f32 %v1210_v37, 0.0  ;;  %v1464_v14 = vmul.f32 %v1432_v18, %v2743_v31 }
 0x23f   :  { %v1312_v17 = vmul.f32 %v1962_v30, %v1241_v52  ;;  %vm1318_vm10 = vweird.f32 %v1962_v30  ;;  %v1449_v52 = vld [vmem:[%s3049_s3 + $0x30] sm:$0xff] }
 0x240   :  { %v1242_v60 = vadd.f32 1e-05, %v1226_v59  ;;  %v1480_v24 = vsub.f32 %v1448_v4, %v1464_v14  ;;  %vm1319_vm12 = vmor %vm1317_vm11, %vm1318_vm10 }
 0x241   :  { %v1313_v36 = vmul.f32 %v1962_v30, %v1312_v17  ;;  %v2783_v9 = vpop.xlane.xlu2 %1061  ;;  %v2787_v22 = vpop.xlane.xlu1 %1065 }
 0x242   :  { %1963 = vrsqrt.f32 %v1242_v60  ;;  %v1195_v56 = vmul.f32 %v2783_v9, %v2783_v9  ;;  %1518 = vperm.xlu1 %1947, %v1432_v18   ;;  %1630 = vperm.xlu2 %1948, %v1480_v24   ;;  %v1196_v19 = vmul.f32 %v2787_v22, %v2787_v22  ;;  %vm1327_vm14 = vweird.f32 %v1242_v60 }
 0x243   :  { %v1314_v26 = vmul.f32 0.5, %v1313_v36 }
 0x244   :  { %v1211_v43 = vsub.f32 %v1158_v35, %v1195_v56 }
 0x245   :  { %v1315_v57 = vsub.f32 1.5, %v1314_v26 }
 0x246   :  { %v1227_v33 = vmax.f32 %v1211_v43, 0.0 }
 0x247   :  { %v1316_v31 = vmul.f32 %v1962_v30, %v1315_v57 }
 0x248   :  { %v1964_v25 = vpop.eup %1963  ;;  %v1243_v44 = vadd.f32 1e-05, %v1227_v33 }
 0x249   :  { %v1322_v53 = vmul.f32 %v1964_v25, %v1242_v60  ;;  %v1166_v13 = vpop.xlane.xlu0 %1165  ;;  %v1162_v16 = vpop.xlane.xlu2 %1161  ;;  %v1320_v46 = vsel %vm1319_vm12, %v1962_v30, %v1316_v31  ;;  %vm1328_vm13 = vweird.f32 %v1964_v25  ;;  %v1418_v30 = vld [vmem:[%s3048_s2 + $0x38] sm:$0xff] }
 0x24a   :  { %1965 = vrsqrt.f32 %v1243_v44  ;;  %v1212_v10 = vsub.f32 %v1162_v16, %v1196_v19  ;;  %v1433_v35 = vmul.f32 %v1417_v27, %v1320_v46  ;;  %vm1329_vm15 = vmor %vm1327_vm14, %vm1328_vm13  ;;  %v1450_v60 = vld [vmem:[%s3049_s3 + $0x38] sm:$0xff]  ;;  %vm1337_vm1 = vweird.f32 %v1243_v44 }
 0x24b   :  { %v1323_v12 = vmul.f32 %v1964_v25, %v1322_v53 }
 0x24c   :  { %v1228_v37 = vmax.f32 %v1212_v10, 0.0  ;;  %1523 = vperm.xlu2 %1948, %v1433_v35   ;;  %v1465_v18 = vmul.f32 %v1433_v35, %v2754_v51 }
 0x24d   :  { %v1324_v4 = vmul.f32 0.5, %v1323_v12 }
 0x24e   :  { %v1244_v59 = vadd.f32 1e-05, %v1228_v37  ;;  %v1481_v14 = vsub.f32 %v1449_v52, %v1465_v18 }
 0x24f   :  { %v1325_v17 = vsub.f32 1.5, %v1324_v4 }
 0x250   :  { %v1966_v24 = vpop.eup %1965  ;;  %1967 = vrsqrt.f32 %v1244_v59  ;;  %1635 = vperm.xlu0 %1946, %v1481_v14   ;;  %vm1347_vm4 = vweird.f32 %v1244_v59 }
 0x251   :  { %v1326_v36 = vmul.f32 %v1964_v25, %v1325_v17  ;;  %v1332_v56 = vmul.f32 %v1966_v24, %v1243_v44  ;;  %v2801_v26 = vpop.xlane.xlu0 %1073  ;;  %v2803_v43 = vpop.xlane.xlu2 %1069  ;;  %vm1338_vm0 = vweird.f32 %v1966_v24 }
 0x252   :  { %v1198_v51 = vmul.f32 %v2801_v26, %v2801_v26  ;;  %v1197_v57 = vmul.f32 %v2803_v43, %v2803_v43  ;;  %v1170_v33 = vpop.xlane.xlu1 %1169  ;;  %vm1339_vm2 = vmor %vm1337_vm1, %vm1338_vm0 }
 0x253   :  { %v1330_v31 = vsel %vm1329_vm15, %v1964_v25, %v1326_v36  ;;  %v1333_v27 = vmul.f32 %v1966_v24, %v1332_v56 }
 0x254   :  { %v1434_v19 = vmul.f32 %v1418_v30, %v1330_v31  ;;  %v1213_v53 = vsub.f32 %v1166_v13, %v1197_v57  ;;  %v1214_v16 = vsub.f32 %v1170_v33, %v1198_v51  ;;  %v1419_v13 = vld [vmem:[%s3048_s2 + $0x40] sm:$0xff] }
 0x255   :  { %v1334_v46 = vmul.f32 0.5, %v1333_v27  ;;  %v1451_v31 = vld [vmem:[%s3049_s3 + $0x40] sm:$0xff] }
 0x256   :  { %v1968_v10 = vpop.eup %1967  ;;  %v1466_v35 = vmul.f32 %v1434_v19, %v2772_v61  ;;  %v1229_v12 = vmax.f32 %v1213_v53, 0.0  ;;  %v1230_v52 = vmax.f32 %v1214_v16, 0.0 }
 0x257   :  { %v1335_v37 = vsub.f32 1.5, %v1334_v46  ;;  %v1342_v18 = vmul.f32 %v1968_v10, %v1244_v59  ;;  %vm1348_vm3 = vweird.f32 %v1968_v10 }
 0x258   :  { %v1482_v4 = vsub.f32 %v1450_v60, %v1466_v35  ;;  %v1245_v14 = vadd.f32 1e-05, %v1229_v12  ;;  %v2813_v25 = vadd.f32 1e-05, %v1230_v52  ;;  %1528 = vperm.xlu0 %1946, %v1434_v19   ;;  %vm1349_vm5 = vmor %vm1347_vm4, %vm1348_vm3 }
 0x259   :  { %v1336_v17 = vmul.f32 %v1966_v24, %v1335_v37  ;;  %v1343_v30 = vmul.f32 %v1968_v10, %v1342_v18  ;;  %v1174_v36 = vpop.xlane.xlu2 %1173 }
 0x25a   :  { %1969 = vrsqrt.f32 %v1245_v14  ;;  %v2818_v61 = vpop.xlane.xlu1 %1077  ;;  %1640 = vperm.xlu1 %1947, %v1482_v4   ;;  %vm1357_vm9 = vweird.f32 %v1245_v14  ;;  %vm1367_vm11 = vweird.f32 %v2813_v25 }
 0x25b   :  { %v1340_v56 = vsel %vm1339_vm2, %v1966_v24, %v1336_v17  ;;  %v1344_v51 = vmul.f32 0.5, %v1343_v30  ;;  %1971 = vrsqrt.f32 %v2813_v25  ;;  %v1199_v57 = vmul.f32 %v2818_v61, %v2818_v61  ;;  %v1420_v24 = vld [vmem:[%s3048_s2 + $0x48] sm:$0xff] }
 0x25c   :  { %v1435_v33 = vmul.f32 %v1419_v13, %v1340_v56  ;;  %v1452_v30 = vld [vmem:[%s3049_s3 + $0x48] sm:$0xff] }
 0x25d   :  { %v1345_v44 = vsub.f32 1.5, %v1344_v51  ;;  %v1215_v27 = vsub.f32 %v1174_v36, %v1199_v57 }
 0x25e   :  { %v1467_v19 = vmul.f32 %v1435_v33, %v2783_v9 }
 0x25f   :  { %v1346_v53 = vmul.f32 %v1968_v10, %v1345_v44  ;;  %v1231_v16 = vmax.f32 %v1215_v27, 0.0 }
 0x260   :  { %v1970_v60 = vpop.eup %1969  ;;  %v1483_v46 = vsub.f32 %v1451_v31, %v1467_v19 }
 0x261   :  { %v1972_v35 = vpop.eup %1971  ;;  %v1352_v12 = vmul.f32 %v1970_v60, %v1245_v14  ;;  %v2830_v52 = vadd.f32 1e-05, %v1231_v16  ;;  %v1178_v37 = vpop.xlane.xlu0 %1177  ;;  %v1350_v4 = vsel %vm1349_vm5, %v1968_v10, %v1346_v53  ;;  %vm1358_vm7 = vweird.f32 %v1970_v60  ;;  %v1421_v16 = vld [vmem:[%s3048_s2 + $0x50] sm:$0xff] }
 0x262   :  { %v2832_v18 = vpop.xlane.xlu2 %1081  ;;  %v1362_v9 = vmul.f32 %v1972_v35, %v2813_v25  ;;  %1533 = vperm.xlu1 %1947, %v1435_v33   ;;  %1645 = vperm.xlu2 %1948, %v1483_v46   ;;  %v1436_v13 = vmul.f32 %v1420_v24, %v1350_v4  ;;  %vm1368_vm8 = vweird.f32 %v1972_v35  ;;  %vm1359_vm10 = vmor %vm1357_vm9, %vm1358_vm7  ;;  %v1422_v4 = vld [vmem:[%s3048_s2 + $0x58] sm:$0xff]  ;;  %v1453_v25 = vld [vmem:[%s3049_s3 + $0x50] sm:$0xff] }
 0x263   :  { %v1200_v59 = vmul.f32 %v2832_v18, %v2832_v18  ;;  %v1353_v17 = vmul.f32 %v1970_v60, %v1352_v12  ;;  %1973 = vrsqrt.f32 %v2830_v52  ;;  %vm1369_vm12 = vmor %vm1367_vm11, %vm1368_vm8  ;;  %vm1377_vm14 = vweird.f32 %v2830_v52 }
 0x264   :  { %v1363_v36 = vmul.f32 %v1972_v35, %v1362_v9  ;;  %v1468_v51 = vmul.f32 %v1436_v13, %v2787_v22 }
 0x265   :  { %v1216_v56 = vsub.f32 %v1178_v37, %v1200_v59  ;;  %v1354_v10 = vmul.f32 0.5, %v1353_v17 }
 0x266   :  { %v1364_v57 = vmul.f32 0.5, %v1363_v36  ;;  %v1484_v44 = vsub.f32 %v1452_v30, %v1468_v51 }
 0x267   :  { %v1232_v31 = vmax.f32 %v1216_v56, 0.0  ;;  %v1355_v27 = vsub.f32 1.5, %v1354_v10 }
 0x268   :  { %v1365_v33 = vsub.f32 1.5, %v1364_v57  ;;  %1650 = vperm.xlu0 %1946, %v1484_v44  }
 0x269   :  { %v2842_v19 = vadd.f32 1e-05, %v1232_v31  ;;  %v1974_v53 = vpop.eup %1973  ;;  %v1356_v24 = vmul.f32 %v1970_v60, %v1355_v27  ;;  %v2847_v46 = vpop.xlane.xlu0 %1085 }
 0x26a   :  { %v1182_v22 = vpop.xlane.xlu1 %1181  ;;  %v1366_v12 = vmul.f32 %v1972_v35, %v1365_v33  ;;  %v1372_v37 = vmul.f32 %v1974_v53, %v2830_v52  ;;  %1538 = vperm.xlu2 %1948, %v1436_v13   ;;  %v1201_v14 = vmul.f32 %v2847_v46, %v2847_v46  ;;  %vm1378_vm13 = vweird.f32 %v1974_v53 }
 0x26b   :  { %1975 = vrsqrt.f32 %v2842_v19  ;;  %v1360_v9 = vsel %vm1359_vm10, %v1970_v60, %v1356_v24  ;;  %v1454_v60 = vld [vmem:[%s3049_s3 + $0x58] sm:$0xff]  ;;  %vm1379_vm15 = vmor %vm1377_vm14, %vm1378_vm13  ;;  %vm1387_vm1 = vweird.f32 %v2842_v19 }
 0x26c   :  { %v1437_v59 = vmul.f32 %v1421_v16, %v1360_v9  ;;  %v1373_v17 = vmul.f32 %v1974_v53, %v1372_v37  ;;  %v1370_v30 = vsel %vm1369_vm12, %v1972_v35, %v1366_v12  ;;  %v1217_v36 = vsub.f32 %v1182_v22, %v1201_v14 }
 0x26d   :  { %v1438_v56 = vmul.f32 %v1422_v4, %v1370_v30 }
 0x26e   :  { %v1469_v13 = vmul.f32 %v1437_v59, %v2803_v43  ;;  %v1374_v51 = vmul.f32 0.5, %v1373_v17  ;;  %v1233_v10 = vmax.f32 %v1217_v36, 0.0  ;;  %v1423_v43 = vld [vmem:[%s3048_s2 + $0x60] sm:$0xff] }
 0x26f   :  { %v1470_v57 = vmul.f32 %v1438_v56, %v2801_v26  ;;  %v1455_v17 = vld [vmem:[%s3049_s3 + $0x60] sm:$0xff] }
 0x270   :  { %v1485_v44 = vsub.f32 %v1453_v25, %v1469_v13  ;;  %v1375_v27 = vsub.f32 1.5, %v1374_v51  ;;  %1543 = vperm.xlu0 %1946, %v1437_v59   ;;  %v1249_v33 = vadd.f32 1e-05, %v1233_v10 }
 0x271   :  { %v1976_v31 = vpop.eup %1975  ;;  %v1486_v24 = vsub.f32 %v1454_v60, %v1470_v57  ;;  %v1186_v37 = vpop.xlane.xlu2 %1185  ;;  %v1424_v57 = vld [vmem:[%s3048_s2 + $0x68] sm:$0xff] }
 0x272   :  { %v1382_v35 = vmul.f32 %v1976_v31, %v2842_v19  ;;  %v2867_v16 = vpop.xlane.xlu1 %1089  ;;  %v1376_v22 = vmul.f32 %v1974_v53, %v1375_v27  ;;  %1655 = vperm.xlu1 %1947, %v1485_v44   ;;  %1977 = vrsqrt.f32 %v1249_v33  ;;  %vm1388_vm0 = vweird.f32 %v1976_v31  ;;  %v1425_v19 = vld [vmem:[%s3048_s2 + $0x70] sm:$0xff] }
 0x273   :  { %v1202_v26 = vmul.f32 %v2867_v16, %v2867_v16  ;;  %1660 = vperm.xlu2 %1948, %v1486_v24   ;;  %vm1389_vm2 = vmor %vm1387_vm1, %vm1388_vm0  ;;  %vm1397_vm4 = vweird.f32 %v1249_v33 }
 0x274   :  { %v1383_v12 = vmul.f32 %v1976_v31, %v1382_v35  ;;  %v1380_v4 = vsel %vm1379_vm15, %v1974_v53, %v1376_v22 }
 0x275   :  { %v1218_v9 = vsub.f32 %v1186_v37, %v1202_v26  ;;  %v1439_v14 = vmul.f32 %v1423_v43, %v1380_v4 }
 0x276   :  { %v1384_v59 = vmul.f32 0.5, %v1383_v12 }
 0x277   :  { %v1234_v30 = vmax.f32 %v1218_v9, 0.0  ;;  %v1471_v52 = vmul.f32 %v1439_v14, %v2818_v61 }
 0x278   :  { %v1385_v25 = vsub.f32 1.5, %v1384_v59  ;;  %v1978_v13 = vpop.eup %1977 }
 0x279   :  { %v1250_v36 = vadd.f32 1e-05, %v1234_v30  ;;  %v1487_v51 = vsub.f32 %v1455_v17, %v1471_v52  ;;  %v1392_v10 = vmul.f32 %v1978_v13, %v1249_v33  ;;  %vm1398_vm3 = vweird.f32 %v1978_v13  ;;  %v1426_v30 = vld [vmem:[%s3048_s2 + $0x78] sm:$0xff] }
 0x27a   :  { %v1386_v60 = vmul.f32 %v1976_v31, %v1385_v25  ;;  %1548 = vperm.xlu1 %1947, %v1438_v56   ;;  %vm1399_vm5 = vmor %vm1397_vm4, %vm1398_vm3 }
 0x27b   :  { %1979 = vrsqrt.f32 %v1250_v36  ;;  %1553 = vperm.xlu2 %1948, %v1439_v14   ;;  %1665 = vperm.xlu0 %1946, %v1487_v51   ;;  %v1393_v53 = vmul.f32 %v1978_v13, %v1392_v10  ;;  %vm1407_vm8 = vweird.f32 %v1250_v36  ;;  %v1456_v51 = vld [vmem:[%s3049_s3 + $0x68] sm:$0xff] }
 0x27c   :  { %v1390_v61 = vsel %vm1389_vm2, %v1976_v31, %v1386_v60 }
 0x27d   :  { %v1394_v44 = vmul.f32 0.5, %v1393_v53  ;;  %v1440_v43 = vmul.f32 %v1424_v57, %v1390_v61 }
 0x27f   :  { %v1395_v35 = vsub.f32 1.5, %v1394_v44  ;;  %v1472_v17 = vmul.f32 %v1440_v43, %v2832_v18 }
 0x280   :  { %v1504_v24 = vpop.permute.xlu2 %1503 }
 0x281   :  { %v1980_v27 = vpop.eup %1979  ;;  %v1396_v56 = vmul.f32 %v1978_v13, %v1395_v35  ;;  %v1575_v14 = vmul.f32 %v1504_v24, %v2504_v55  ;;  %v1576_v59 = vmul.f32 %v1504_v24, %v2500_v3  ;;  %v1488_v18 = vsub.f32 %v1456_v51, %v1472_v17 }
 0x282   :  { %v1402_v22 = vmul.f32 %v1980_v27, %v1250_v36  ;;  %vm1408_vm7 = vweird.f32 %v1980_v27  ;;  %v1458_v36 = vld [vmem:[%s3049_s3 + $0x78] sm:$0xff] }
 0x283   :  { %1558 = vperm.xlu0 %1946, %v1440_v43   ;;  %v1400_v12 = vsel %vm1399_vm5, %v1978_v13, %v1396_v56  ;;  %vm1409_vm9 = vmor %vm1407_vm8, %vm1408_vm7 }
 0x284   :  { %v1403_v26 = vmul.f32 %v1980_v27, %v1402_v22  ;;  %v1441_v4 = vmul.f32 %v1425_v19, %v1400_v12 }
 0x286   :  { %v1404_v37 = vmul.f32 0.5, %v1403_v26  ;;  %v1494_v31 = vpop.permute.xlu0 %1493  ;;  %1563 = vperm.xlu1 %1947, %v1441_v4   ;;  %v1473_v24 = vmul.f32 %v1441_v4, %v2847_v46 }
 0x287   :  { %v1571_v60 = vmul.f32 %v1494_v31, %v2462_v47  ;;  %v1572_v10 = vmul.f32 %v1494_v31, %v2458_v28  ;;  %v1457_v47 = vld [vmem:[%s3049_s3 + $0x70] sm:$0xff] }
 0x288   :  { %v1405_v9 = vsub.f32 1.5, %v1404_v37  ;;  %v1616_v33 = vpop.permute.xlu2 %1615  ;;  %v1489_v28 = vsub.f32 %v1457_v47, %v1473_v24 }
 0x289   :  { %v1687_v25 = vadd.f32 %v1616_v33, %v1575_v14  ;;  %v1688_v13 = vadd.f32 %v1616_v33, %v1576_v59 }
 0x28a   :  { %v1406_v52 = vmul.f32 %v1980_v27, %v1405_v9 }
 0x28b   :  { %1719 = vst [vmem:[%s3050_s5 + $0x20] sm:$0xff] %v1687_v25 }
 0x28c   :  { %v1410_v55 = vsel %vm1409_vm9, %v1980_v27, %v1406_v52  ;;  %1720 = vst.msk [vmem:[%s3050_s5 + $0x28] sm:$0xff] %vm1026_vm6, %v1688_v13 }
 0x28d   :  { %v1442_v3 = vmul.f32 %v1426_v30, %v1410_v55 }
 0x28e   :  { %v1606_v57 = vpop.permute.xlu0 %1605  ;;  %1670 = vperm.xlu1 %1947, %v1488_v18  }
 0x28f   :  { %v1474_v53 = vmul.f32 %v1442_v3, %v2867_v16  ;;  %1568 = vperm.xlu2 %1948, %v1442_v3   ;;  %v1683_v61 = vadd.f32 %v1606_v57, %v1571_v60  ;;  %v1684_v44 = vadd.f32 %v1606_v57, %v1572_v10 }
 0x290   :  { %v1499_v35 = vpop.permute.xlu1 %1498  ;;  %v1514_v4 = vpop.permute.xlu2 %1513 }
 0x291   :  { %v1490_v27 = vsub.f32 %v1458_v36, %v1474_v53  ;;  %1715 = vst [vmem:[%s3050_s5] sm:$0xff] %v1683_v61  ;;  %v1573_v16 = vmul.f32 %v1499_v35, %v2482_v21  ;;  %v1574_v46 = vmul.f32 %v1499_v35, %v2478_v34  ;;  %v1579_v31 = vmul.f32 %v1514_v4, %v2544_v11 }
 0x292   :  { %1716 = vst.msk [vmem:[%s3050_s5 + $0x8] sm:$0xff] %vm1026_vm6, %v1684_v44  ;;  %v1580_v9 = vmul.f32 %v1514_v4, %v2540_v54 }
 0x293   :  { %1680 = vperm.xlu0 %1946, %v1490_v27  }
 0x297   :  { %1675 = vperm.xlu2 %1948, %v1489_v28  }
 0x298   :  { %v1611_v43 = vpop.permute.xlu1 %1610 }
 0x299   :  { %v1685_v22 = vadd.f32 %v1611_v43, %v1573_v16  ;;  %v1686_v56 = vadd.f32 %v1611_v43, %v1574_v46 }
 0x29b   :  { %1717 = vst [vmem:[%s3050_s5 + $0x10] sm:$0xff] %v1685_v22 }
 0x29c   :  { %1718 = vst.msk [vmem:[%s3050_s5 + $0x18] sm:$0xff] %vm1026_vm6, %v1686_v56  ;;  %v1631_v11 = vpop.permute.xlu2 %1630 }
 0x2a0   :  { %v1509_v19 = vpop.permute.xlu1 %1508 }
 0x2a1   :  { %v1577_v26 = vmul.f32 %v1509_v19, %v2526_v48  ;;  %v1578_v12 = vmul.f32 %v1509_v19, %v2520_v42 }
 0x2a2   :  { %v1621_v21 = vpop.permute.xlu0 %1620 }
 0x2a3   :  { %v1689_v37 = vadd.f32 %v1621_v21, %v1577_v26  ;;  %v1690_v34 = vadd.f32 %v1621_v21, %v1578_v12 }
 0x2a5   :  { %1721 = vst [vmem:[%s3050_s5 + $0x30] sm:$0xff] %v1689_v37 }
 0x2a6   :  { %1722 = vst.msk [vmem:[%s3050_s5 + $0x38] sm:$0xff] %vm1026_vm6, %v1690_v34  ;;  %v1524_v52 = vpop.permute.xlu2 %1523 }
 0x2a7   :  { %v1583_v25 = vmul.f32 %v1524_v52, %v2580_v29  ;;  %v1584_v13 = vmul.f32 %v1524_v52, %v2576_v6 }
 0x2ac   :  { %v1626_v48 = vpop.permute.xlu1 %1625 }
 0x2ad   :  { %v1691_v14 = vadd.f32 %v1626_v48, %v1579_v31  ;;  %v1692_v42 = vadd.f32 %v1626_v48, %v1580_v9 }
 0x2af   :  { %1723 = vst [vmem:[%s3050_s5 + $0x40] sm:$0xff] %v1691_v14 }
 0x2b0   :  { %1724 = vst.msk [vmem:[%s3050_s5 + $0x48] sm:$0xff] %vm1026_vm6, %v1692_v42 }
 0x2b4   :  { %v1519_v59 = vpop.permute.xlu1 %1518 }
 0x2b5   :  { %v1581_v33 = vmul.f32 %v1519_v59, %v2562_v23  ;;  %v1582_v17 = vmul.f32 %v1519_v59, %v2558_v0 }
 0x2b7   :  { %v1693_v30 = vadd.f32 %v1631_v11, %v1581_v33  ;;  %v1694_v54 = vadd.f32 %v1631_v11, %v1582_v17 }
 0x2b9   :  { %1725 = vst [vmem:[%s3050_s5 + $0x50] sm:$0xff] %v1693_v30 }
 0x2ba   :  { %1726 = vst.msk [vmem:[%s3050_s5 + $0x58] sm:$0xff] %vm1026_vm6, %v1694_v54 }
 0x2bc   :  { %v1646_v3 = vpop.permute.xlu2 %1645 }
 0x2c2   :  { %v1636_v23 = vpop.permute.xlu0 %1635 }
 0x2c3   :  { %v1695_v51 = vadd.f32 %v1636_v23, %v1583_v25  ;;  %v1696_v0 = vadd.f32 %v1636_v23, %v1584_v13 }
 0x2c4   :  { %v1539_v53 = vpop.permute.xlu2 %1538 }
 0x2c5   :  { %1727 = vst [vmem:[%s3050_s5 + $0x60] sm:$0xff] %v1695_v51  ;;  %v1589_v44 = vmul.f32 %v1539_v53, %v2619_v15  ;;  %v1590_v27 = vmul.f32 %v1539_v53, %v2617_v32 }
 0x2c6   :  { %1728 = vst.msk [vmem:[%s3050_s5 + $0x68] sm:$0xff] %vm1026_vm6, %v1696_v0 }
 0x2ca   :  { %v1529_v55 = vpop.permute.xlu0 %1528 }
 0x2cb   :  { %v1585_v18 = vmul.f32 %v1529_v55, %v2590_v58  ;;  %v1586_v29 = vmul.f32 %v1529_v55, %v2588_v8 }
 0x2cc   :  { %v1641_v36 = vpop.permute.xlu1 %1640 }
 0x2cd   :  { %v1697_v6 = vadd.f32 %v1641_v36, %v1585_v18  ;;  %v1698_v60 = vadd.f32 %v1641_v36, %v1586_v29 }
 0x2cf   :  { %1729 = vst [vmem:[%s3050_s5 + $0x70] sm:$0xff] %v1697_v6 }
 0x2d0   :  { %1730 = vst.msk [vmem:[%s3050_s5 + $0x78] sm:$0xff] %vm1026_vm6, %v1698_v60 }
 0x2d4   :  { %v1534_v10 = vpop.permute.xlu1 %1533 }
 0x2d5   :  { %v1587_v57 = vmul.f32 %v1534_v10, %v2605_v62  ;;  %v1588_v58 = vmul.f32 %v1534_v10, %v2603_v49  ;;  %v1661_v49 = vpop.permute.xlu2 %1660 }
 0x2d7   :  { %v1699_v61 = vadd.f32 %v1646_v3, %v1587_v57  ;;  %v1700_v8 = vadd.f32 %v1646_v3, %v1588_v58 }
 0x2d9   :  { %1731 = vst [vmem:[%s3050_s5 + $0x80] sm:$0xff] %v1699_v61 }
 0x2da   :  { %1732 = vst.msk [vmem:[%s3050_s5 + $0x88] sm:$0xff] %vm1026_vm6, %v1700_v8  ;;  %v1651_v35 = vpop.permute.xlu0 %1650 }
 0x2db   :  { %v1701_v24 = vadd.f32 %v1651_v35, %v1589_v44  ;;  %v1702_v62 = vadd.f32 %v1651_v35, %v1590_v27 }
 0x2dd   :  { %1733 = vst [vmem:[%s3050_s5 + $0x90] sm:$0xff] %v1701_v24  ;;  %v1554_v43 = vpop.permute.xlu2 %1553 }
 0x2de   :  { %1734 = vst.msk [vmem:[%s3050_s5 + $0x98] sm:$0xff] %vm1026_vm6, %v1702_v62  ;;  %v1595_v22 = vmul.f32 %v1554_v43, %v2662_v38  ;;  %v1596_v56 = vmul.f32 %v1554_v43, %v2660_v1 }
 0x2e2   :  { %v1544_v32 = vpop.permute.xlu0 %1543 }
 0x2e3   :  { %v1591_v15 = vmul.f32 %v1544_v32, %v2632_v2  ;;  %v1592_v47 = vmul.f32 %v1544_v32, %v2630_v20 }
 0x2e4   :  { %v1656_v28 = vpop.permute.xlu1 %1655 }
 0x2e5   :  { %v1703_v16 = vadd.f32 %v1656_v28, %v1591_v15  ;;  %v1704_v46 = vadd.f32 %v1656_v28, %v1592_v47 }
 0x2e7   :  { %1735 = vst [vmem:[%s3050_s5 + $0xa0] sm:$0xff] %v1703_v16 }
 0x2e8   :  { %1736 = vst.msk [vmem:[%s3050_s5 + $0xa8] sm:$0xff] %vm1026_vm6, %v1704_v46 }
 0x2e9   :  { %v1569_v4 = vpop.permute.xlu2 %1568 }
 0x2ea   :  { %v1601_v33 = vmul.f32 %v1569_v4, %v2704_v7  ;;  %v1602_v17 = vmul.f32 %v1569_v4, %v2702_v63 }
 0x2ec   :  { %v1549_v2 = vpop.permute.xlu1 %1548 }
 0x2ed   :  { %v1666_v19 = vpop.permute.xlu0 %1665  ;;  %v1593_v20 = vmul.f32 %v1549_v2, %v2647_v39  ;;  %v1594_v26 = vmul.f32 %v1549_v2, %v2645_v41 }
 0x2ee   :  { %v1707_v12 = vadd.f32 %v1666_v19, %v1595_v22  ;;  %v1708_v21 = vadd.f32 %v1666_v19, %v1596_v56 }
 0x2ef   :  { %v1705_v37 = vadd.f32 %v1661_v49, %v1593_v20  ;;  %v1706_v34 = vadd.f32 %v1661_v49, %v1594_v26 }
 0x2f0   :  { %1739 = vst [vmem:[%s3050_s5 + $0xc0] sm:$0xff] %v1707_v12 }
 0x2f1   :  { %1740 = vst.msk [vmem:[%s3050_s5 + $0xc8] sm:$0xff] %vm1026_vm6, %v1708_v21  ;;  %v1676_v38 = vpop.permute.xlu2 %1675 }
 0x2f2   :  { %1737 = vst [vmem:[%s3050_s5 + $0xb0] sm:$0xff] %v1705_v37 }
 0x2f3   :  { %1738 = vst.msk [vmem:[%s3050_s5 + $0xb8] sm:$0xff] %vm1026_vm6, %v1706_v34 }
 0x2f5   :  { %v1559_v31 = vpop.permute.xlu0 %1558 }
 0x2f6   :  { %v1597_v14 = vmul.f32 %v1559_v31, %v2676_v40  ;;  %v1598_v42 = vmul.f32 %v1559_v31, %v2674_v45 }
 0x2f8   :  { %v1564_v41 = vpop.permute.xlu1 %1563 }
 0x2f9   :  { %v1599_v39 = vmul.f32 %v1564_v41, %v2690_v5  ;;  %v1600_v1 = vmul.f32 %v1564_v41, %v2688_v50 }
 0x2fb   :  { %v1711_v9 = vadd.f32 %v1676_v38, %v1599_v39  ;;  %v1712_v48 = vadd.f32 %v1676_v38, %v1600_v1 }
 0x2fd   :  { %1743 = vst [vmem:[%s3050_s5 + $0xe0] sm:$0xff] %v1711_v9 }
 0x2fe   :  { %1744 = vst.msk [vmem:[%s3050_s5 + $0xe8] sm:$0xff] %vm1026_vm6, %v1712_v48 }
 0x300   :  { %v1671_v5 = vpop.permute.xlu1 %1670 }
 0x301   :  { %v1709_v59 = vadd.f32 %v1671_v5, %v1597_v14  ;;  %v1710_v50 = vadd.f32 %v1671_v5, %v1598_v42 }
 0x303   :  { %1741 = vst [vmem:[%s3050_s5 + $0xd0] sm:$0xff] %v1709_v59 }
 0x304   :  { %1742 = vst.msk [vmem:[%s3050_s5 + $0xd8] sm:$0xff] %vm1026_vm6, %v1710_v50 }
 0x305   :  { %v1681_v11 = vpop.permute.xlu0 %1680 }
 0x306   :  { %v1713_v40 = vadd.f32 %v1681_v11, %v1601_v33  ;;  %v1714_v30 = vadd.f32 %v1681_v11, %v1602_v17 }
 0x308   :  { %1745 = vst [vmem:[%s3050_s5 + $0xf0] sm:$0xff] %v1713_v40 }
 0x309   :  { %1746 = vst.msk [vmem:[%s3050_s5 + $0xf8] sm:$0xff] %vm1026_vm6, %v1714_v30 }

</bundles_post_ra>
